<compile_context>
chip_gen: v7x
topology: tpu7x:2x2x1
jax: 0.10.0
libtpu: 0.0.40
codegen_flags: <defaults>
</compile_context>

<pallas_src>
import functools

import jax
import jax.numpy as jnp
from jax import lax
from jax.experimental import pallas as pl
from jax.experimental.pallas import tpu as pltpu

_BF16 = jnp.bfloat16
_F32 = jnp.float32


# ---------------------------------------------------------------------------
# Shared fused block: SelfAttention + residual + LayerNorm + softmax(dim=-2)
# (operates on ONE batch element: x is a [N, D] f32 value in VMEM)
# ---------------------------------------------------------------------------
def _attention_block(x, wqkv, bqkv, wproj, bproj, gamma, beta, ctx_ref, *,
                     num_heads, eps):
    N, D = x.shape
    H = num_heads
    hd = D // H
    scale = float(hd) ** -0.5

    # ---- qkv projection: non-batched weight, bf16 MXU operands, f32 accumulation ----
    qkv = jnp.dot(x.astype(_BF16), wqkv.astype(_BF16),
                  preferred_element_type=_F32) + bqkv              # [N, 3D]
    q = qkv[:, 0 * D:1 * D] * scale        # fold 1/sqrt(hd) into q (softmax-equivalent)
    k = qkv[:, 1 * D:2 * D]
    v = qkv[:, 2 * D:3 * D]
    kT = k.T                               # one XLU transpose shared by all heads

    # ---- per-head attention: softmax(q_h @ k_h^T) @ v_h  (exact per-head FLOPs) ----
    # Per-head context is stored at its static lane offset in a VMEM scratch and read
    # back once for the output projection (no concatenate, no head masks).
    for h in range(H):
        sl = slice(h * hd, (h + 1) * hd)
        s = jnp.dot(q[:, sl].astype(_BF16), kT[sl, :].astype(_BF16),
                    preferred_element_type=_F32)                   # [N, N]
        s = s - jnp.max(s, axis=-1, keepdims=True)
        e = jnp.exp(s)
        attn = e * pl.reciprocal(jnp.sum(e, axis=-1, keepdims=True), approx=True)
        # attn_drop: identity (eval mode)
        ctx_ref[:, sl] = jnp.dot(attn.astype(_BF16), v[:, sl].astype(_BF16),
                                 preferred_element_type=_F32)

    # ---- output projection + residual (proj_drop: identity) ----
    ctx = ctx_ref[...]
    y = jnp.dot(ctx.astype(_BF16), wproj.astype(_BF16),
                preferred_element_type=_F32) + bproj + x

    # ---- LayerNorm over features (biased variance, eps=1e-12) ----
    u = jnp.mean(y, axis=-1, keepdims=True)
    var = jnp.mean((y - u) * (y - u), axis=-1, keepdims=True)
    yn = gamma * ((y - u) * lax.rsqrt(var + eps)) + beta

    # ---- softmax over dim=-2 (token axis). Exact divide: this is the module output ----
    yn = yn - jnp.max(yn, axis=0, keepdims=True)
    ez = jnp.exp(yn)
    return ez / jnp.sum(ez, axis=0, keepdims=True)


# ---------------------------------------------------------------------------
# Stage A kernel: backbone stand-in (1x1 conv + ReLU) + channel self-attention
# ---------------------------------------------------------------------------
def _channel_stage_kernel(img_ref, cw_ref, cb_ref,
                          wqkv_ref, bqkv_ref, wproj_ref, bproj_ref,
                          gamma_ref, beta_ref, out_ref, ctx_ref, *, num_heads, eps):
    img = img_ref[0]                                     # [Cin, HW]
    cw = cw_ref[...]                                     # [C, Cin]
    cin = img.shape[0]

    # 1x1-conv stand-in: K=Cin(=3) is far too shallow for the MXU -> do it as Cin
    # VPU rank-1 FMAs (broadcast outer products) instead of a systolic pass.
    feat = jnp.zeros((cw.shape[0], img.shape[1]), _F32)
    for c in range(cin):
        feat = feat + cw[:, c:c + 1] * img[c:c + 1, :]
    feat = jnp.maximum(feat + cb_ref[...], 0.0)          # [C, HW]

    # channel self-attention: tokens = C channels, features = HW pixels
    out_ref[0] = _attention_block(
        feat, wqkv_ref[...], bqkv_ref[...], wproj_ref[...], bproj_ref[...],
        gamma_ref[...], beta_ref[...], ctx_ref, num_heads=num_heads, eps=eps)


def channel_stage(img, conv_w, conv_b, wqkv, bqkv, wproj, bproj, gamma, beta,
                  *, num_heads, eps=1e-12):
    B, Cin, HW = img.shape
    C = conv_w.shape[0]
    kernel = functools.partial(_channel_stage_kernel, num_heads=num_heads, eps=eps)
    w2 = lambda b: (0, 0)
    return pl.pallas_call(
        kernel,
        out_shape=jax.ShapeDtypeStruct((B, C, HW), jnp.float32),
        grid=(B,),
        in_specs=[
            pl.BlockSpec((1, Cin, HW), lambda b: (b, 0, 0)),
            pl.BlockSpec((C, Cin), w2),
            pl.BlockSpec((C, 1), w2),
            pl.BlockSpec((HW, 3 * HW), w2),
            pl.BlockSpec((1, 3 * HW), w2),
            pl.BlockSpec((HW, HW), w2),
            pl.BlockSpec((1, HW), w2),
            pl.BlockSpec((1, HW), w2),
            pl.BlockSpec((1, HW), w2),
        ],
        out_specs=pl.BlockSpec((1, C, HW), lambda b: (b, 0, 0)),
        scratch_shapes=[pltpu.VMEM((C, HW), jnp.float32)],
        compiler_params=pltpu.CompilerParams(
            dimension_semantics=("parallel",),
            vmem_limit_bytes=32 * 1024 * 1024),
    )(img, conv_w, conv_b, wqkv, bqkv, wproj, bproj, gamma, beta)


# ---------------------------------------------------------------------------
# Stage B kernel: spatial self-attention + final permute(0, 2, 1) folded in
# ---------------------------------------------------------------------------
def _spatial_stage_kernel(z_ref, wqkv_ref, bqkv_ref, wproj_ref, bproj_ref,
                          gamma_ref, beta_ref, out_ref, ctx_ref, *, num_heads, eps):
    z = z_ref[0]                                         # [HW, C]
    res = _attention_block(
        z, wqkv_ref[...], bqkv_ref[...], wproj_ref[...], bproj_ref[...],
        gamma_ref[...], beta_ref[...], ctx_ref, num_heads=num_heads, eps=eps)  # [HW, C]
    out_ref[0] = res.T                                   # permute(0,2,1): out is [C, HW]


def spatial_stage(z, wqkv, bqkv, wproj, bproj, gamma, beta, *, num_heads, eps=1e-12):
    B, HW, C = z.shape
    kernel = functools.partial(_spatial_stage_kernel, num_heads=num_heads, eps=eps)
    w2 = lambda b: (0, 0)
    return pl.pallas_call(
        kernel,
        out_shape=jax.ShapeDtypeStruct((B, C, HW), jnp.float32),
        grid=(B,),
        in_specs=[
            pl.BlockSpec((1, HW, C), lambda b: (b, 0, 0)),
            pl.BlockSpec((C, 3 * C), w2),
            pl.BlockSpec((1, 3 * C), w2),
            pl.BlockSpec((C, C), w2),
            pl.BlockSpec((1, C), w2),
            pl.BlockSpec((1, C), w2),
            pl.BlockSpec((1, C), w2),
        ],
        out_specs=pl.BlockSpec((1, C, HW), lambda b: (b, 0, 0)),
        scratch_shapes=[pltpu.VMEM((HW, C), jnp.float32)],
        compiler_params=pltpu.CompilerParams(
            dimension_semantics=("parallel",),
            vmem_limit_bytes=32 * 1024 * 1024),
    )(z, wqkv, bqkv, wproj, bproj, gamma, beta)


# ---------------------------------------------------------------------------
# Parameter construction (deterministic, synthetic)
# ---------------------------------------------------------------------------
def init_params(key, cin, c_feat, hw, ch_heads, sp_heads):
    ks = jax.random.split(key, 8)
    p = {}
    # stand-in backbone
    p["conv_w"] = 0.05 * jax.random.normal(ks[0], (c_feat, cin), jnp.float32)
    p["conv_b"] = jnp.zeros((c_feat, 1), jnp.float32)
    # channel self-attention (dim = hw)
    p["ch_wqkv"] = 0.05 * jax.random.normal(ks[1], (hw, 3 * hw), jnp.float32)
    p["ch_bqkv"] = jnp.zeros((1, 3 * hw), jnp.float32)
    p["ch_wproj"] = 0.05 * jax.random.normal(ks[2], (hw, hw), jnp.float32)
    p["ch_bproj"] = jnp.zeros((1, hw), jnp.float32)
    p["ch_gamma"] = jnp.ones((1, hw), jnp.float32)
    p["ch_beta"] = jnp.zeros((1, hw), jnp.float32)
    # spatial self-attention (dim = c_feat)
    p["sp_wqkv"] = 0.05 * jax.random.normal(ks[3], (c_feat, 3 * c_feat), jnp.float32)
    p["sp_bqkv"] = jnp.zeros((1, 3 * c_feat), jnp.float32)
    p["sp_wproj"] = 0.05 * jax.random.normal(ks[4], (c_feat, c_feat), jnp.float32)
    p["sp_bproj"] = jnp.zeros((1, c_feat), jnp.float32)
    p["sp_gamma"] = jnp.ones((1, c_feat), jnp.float32)
    p["sp_beta"] = jnp.zeros((1, c_feat), jnp.float32)
    p["ch_heads"] = ch_heads
    p["sp_heads"] = sp_heads
    return p


# ---------------------------------------------------------------------------
# Full CNN_SASM forward
# ---------------------------------------------------------------------------
def cnn_sasm_forward(x_img, p):
    B, Cin, Himg, Wimg = x_img.shape
    HW = Himg * Wimg
    img = x_img.reshape(B, Cin, HW)                      # free metadata reshape

    # stage A: backbone stand-in + channel SA + residual + LN + softmax(dim=-2)
    x_channel = channel_stage(
        img, p["conv_w"], p["conv_b"],
        p["ch_wqkv"], p["ch_bqkv"], p["ch_wproj"], p["ch_bproj"],
        p["ch_gamma"], p["ch_beta"], num_heads=p["ch_heads"])          # [B, C, HW]
    C = x_channel.shape[1]

    # torch: residual_spatial = x_channel.reshape(B, w*h, C) -- a raw row-major
    # reinterpretation of the contiguous buffer (NOT a permute); free XLA reshape.
    z = x_channel.reshape(B, HW, C)

    # stage B: spatial SA + residual + LN2 + softmax(dim=-2) + permute(0,2,1) (in-kernel)
    out = spatial_stage(
        z, p["sp_wqkv"], p["sp_bqkv"], p["sp_wproj"], p["sp_bproj"],
        p["sp_gamma"], p["sp_beta"], num_heads=p["sp_heads"])          # [B, C, HW]

    return out.reshape(B, C, Himg, Wimg)                 # free metadata reshape


if __name__ == "__main__":
    # Small shapes consistent with the module:
    #   batch=2, image channels=3, spatial 4x4 (=> tokens w*h=16),
    #   feature channels C=32 (channel-attn dim=16 / 4 heads, spatial-attn dim=32 / 8 heads)
    B, Cin, Himg, Wimg = 2, 3, 4, 4
    C_FEAT = 32
    HW = Himg * Wimg

    key = jax.random.PRNGKey(0)
    k_x, k_p = jax.random.split(key)
    x_img = jax.random.normal(k_x, (B, Cin, Himg, Wimg), jnp.float32)
    params = init_params(k_p, Cin, C_FEAT, HW, ch_heads=4, sp_heads=8)

    out = cnn_sasm_forward(x_img, params)
    out = jax.block_until_ready(out)
    assert out.shape == (B, C_FEAT, Himg, Wimg), out.shape
    assert bool(jnp.all(jnp.isfinite(out)))
    print("KERNEL_OK")
</pallas_src>

<mosaic_0001>
module attributes {stable_mosaic.version = 11 : i64} {
  func.func @_channel_stage_kernel(%arg0: i32, %arg1: memref<1x3x16xf32, #tpu.memory_space<vmem>>, %arg2: memref<32x3xf32, #tpu.memory_space<vmem>>, %arg3: memref<32x1xf32, #tpu.memory_space<vmem>>, %arg4: memref<16x48xf32, #tpu.memory_space<vmem>>, %arg5: memref<1x48xf32, #tpu.memory_space<vmem>>, %arg6: memref<16x16xf32, #tpu.memory_space<vmem>>, %arg7: memref<1x16xf32, #tpu.memory_space<vmem>>, %arg8: memref<1x16xf32, #tpu.memory_space<vmem>>, %arg9: memref<1x16xf32, #tpu.memory_space<vmem>>, %arg10: memref<1x32x16xf32, #tpu.memory_space<vmem>>, %arg11: memref<32x16xf32, #tpu.memory_space<vmem>>) attributes {dimension_semantics = [#tpu.dimension_semantics<parallel>], iteration_bounds = array<i64: 2>, scalar_prefetch = 0 : i64, scratch_operands = 1 : i64, tpu.core_type = #tpu.core_type<tc>, window_params = [{transform_indices = @transform_0, window_bounds = array<i64: 1, 3, 16>}, {pipeline_mode = #tpu.pipeline_mode<synchronous>, transform_indices = @transform_1, window_bounds = array<i64: 32, 3>}, {pipeline_mode = #tpu.pipeline_mode<synchronous>, transform_indices = @transform_2, window_bounds = array<i64: 32, 1>}, {pipeline_mode = #tpu.pipeline_mode<synchronous>, transform_indices = @transform_3, window_bounds = array<i64: 16, 48>}, {pipeline_mode = #tpu.pipeline_mode<synchronous>, transform_indices = @transform_4, window_bounds = array<i64: 1, 48>}, {pipeline_mode = #tpu.pipeline_mode<synchronous>, transform_indices = @transform_5, window_bounds = array<i64: 16, 16>}, {pipeline_mode = #tpu.pipeline_mode<synchronous>, transform_indices = @transform_6, window_bounds = array<i64: 1, 16>}, {pipeline_mode = #tpu.pipeline_mode<synchronous>, transform_indices = @transform_7, window_bounds = array<i64: 1, 16>}, {pipeline_mode = #tpu.pipeline_mode<synchronous>, transform_indices = @transform_8, window_bounds = array<i64: 1, 16>}, {transform_indices = @transform_9, window_bounds = array<i64: 1, 32, 16>}]} {
    %c0 = arith.constant 0 : index
    %c0_0 = arith.constant 0 : index
    %c0_1 = arith.constant 0 : index
    %0 = vector.load %arg1[%c0, %c0_0, %c0_1] : memref<1x3x16xf32, #tpu.memory_space<vmem>>, vector<1x3x16xf32>
    %1 = vector.shape_cast %0 : vector<1x3x16xf32> to vector<3x16xf32>
    %c0_2 = arith.constant 0 : index
    %c0_3 = arith.constant 0 : index
    %2 = vector.load %arg2[%c0_2, %c0_3] : memref<32x3xf32, #tpu.memory_space<vmem>>, vector<32x3xf32>
    %cst = arith.constant 0.000000e+00 : f32
    %3 = vector.broadcast %cst : f32 to vector<32x16xf32>
    %4 = vector.extract_strided_slice %2 {offsets = [0, 0], sizes = [32, 1], strides = [1, 1]} : vector<32x3xf32> to vector<32x1xf32>
    %5 = vector.extract_strided_slice %1 {offsets = [0, 0], sizes = [1, 16], strides = [1, 1]} : vector<3x16xf32> to vector<1x16xf32>
    %6 = vector.broadcast %4 : vector<32x1xf32> to vector<32x16xf32>
    %7 = vector.broadcast %5 : vector<1x16xf32> to vector<32x16xf32>
    %8 = arith.mulf %6, %7 : vector<32x16xf32>
    %9 = arith.addf %3, %8 : vector<32x16xf32>
    %10 = vector.extract_strided_slice %2 {offsets = [0, 1], sizes = [32, 1], strides = [1, 1]} : vector<32x3xf32> to vector<32x1xf32>
    %11 = vector.extract_strided_slice %1 {offsets = [1, 0], sizes = [1, 16], strides = [1, 1]} : vector<3x16xf32> to vector<1x16xf32>
    %12 = vector.broadcast %10 : vector<32x1xf32> to vector<32x16xf32>
    %13 = vector.broadcast %11 : vector<1x16xf32> to vector<32x16xf32>
    %14 = arith.mulf %12, %13 : vector<32x16xf32>
    %15 = arith.addf %9, %14 : vector<32x16xf32>
    %16 = vector.extract_strided_slice %2 {offsets = [0, 2], sizes = [32, 1], strides = [1, 1]} : vector<32x3xf32> to vector<32x1xf32>
    %17 = vector.extract_strided_slice %1 {offsets = [2, 0], sizes = [1, 16], strides = [1, 1]} : vector<3x16xf32> to vector<1x16xf32>
    %18 = vector.broadcast %16 : vector<32x1xf32> to vector<32x16xf32>
    %19 = vector.broadcast %17 : vector<1x16xf32> to vector<32x16xf32>
    %20 = arith.mulf %18, %19 : vector<32x16xf32>
    %21 = arith.addf %15, %20 : vector<32x16xf32>
    %c0_4 = arith.constant 0 : index
    %c0_5 = arith.constant 0 : index
    %22 = vector.load %arg3[%c0_4, %c0_5] : memref<32x1xf32, #tpu.memory_space<vmem>>, vector<32x1xf32>
    %23 = vector.broadcast %22 : vector<32x1xf32> to vector<32x16xf32>
    %24 = arith.addf %21, %23 : vector<32x16xf32>
    %cst_6 = arith.constant 0.000000e+00 : f32
    %25 = vector.broadcast %cst_6 : f32 to vector<32x16xf32>
    %26 = arith.maximumf %24, %25 : vector<32x16xf32>
    %c0_7 = arith.constant 0 : index
    %c0_8 = arith.constant 0 : index
    %27 = vector.load %arg4[%c0_7, %c0_8] : memref<16x48xf32, #tpu.memory_space<vmem>>, vector<16x48xf32>
    %c0_9 = arith.constant 0 : index
    %c0_10 = arith.constant 0 : index
    %28 = vector.load %arg5[%c0_9, %c0_10] : memref<1x48xf32, #tpu.memory_space<vmem>>, vector<1x48xf32>
    %c0_11 = arith.constant 0 : index
    %c0_12 = arith.constant 0 : index
    %29 = vector.load %arg6[%c0_11, %c0_12] : memref<16x16xf32, #tpu.memory_space<vmem>>, vector<16x16xf32>
    %c0_13 = arith.constant 0 : index
    %c0_14 = arith.constant 0 : index
    %30 = vector.load %arg7[%c0_13, %c0_14] : memref<1x16xf32, #tpu.memory_space<vmem>>, vector<1x16xf32>
    %c0_15 = arith.constant 0 : index
    %c0_16 = arith.constant 0 : index
    %31 = vector.load %arg8[%c0_15, %c0_16] : memref<1x16xf32, #tpu.memory_space<vmem>>, vector<1x16xf32>
    %c0_17 = arith.constant 0 : index
    %c0_18 = arith.constant 0 : index
    %32 = vector.load %arg9[%c0_17, %c0_18] : memref<1x16xf32, #tpu.memory_space<vmem>>, vector<1x16xf32>
    %33 = arith.truncf %26 : vector<32x16xf32> to vector<32x16xbf16>
    %34 = arith.truncf %27 : vector<16x48xf32> to vector<16x48xbf16>
    %cst_19 = arith.constant dense<0.000000e+00> : vector<32x48xf32>
    %35 = tpu.matmul %33, %34, %cst_19 {dimension_numbers = #tpu.dot_dimension_numbers<[1], [0], [0], [1], [0, 0, 1, 1], [], []>} : vector<32x16xbf16>, vector<16x48xbf16>, vector<32x48xf32> -> vector<32x48xf32>
    %36 = vector.broadcast %28 : vector<1x48xf32> to vector<32x48xf32>
    %37 = arith.addf %35, %36 : vector<32x48xf32>
    %38 = vector.extract_strided_slice %37 {offsets = [0, 0], sizes = [32, 16], strides = [1, 1]} : vector<32x48xf32> to vector<32x16xf32>
    %cst_20 = arith.constant 5.000000e-01 : f32
    %39 = vector.broadcast %cst_20 : f32 to vector<32x16xf32>
    %40 = arith.mulf %38, %39 : vector<32x16xf32>
    %41 = vector.extract_strided_slice %37 {offsets = [0, 16], sizes = [32, 16], strides = [1, 1]} : vector<32x48xf32> to vector<32x16xf32>
    %42 = vector.extract_strided_slice %37 {offsets = [0, 32], sizes = [32, 16], strides = [1, 1]} : vector<32x48xf32> to vector<32x16xf32>
    %43 = tpu.transpose %41, [1, 0] : vector<32x16xf32> -> vector<16x32xf32>
    %44 = vector.extract_strided_slice %40 {offsets = [0, 0], sizes = [32, 4], strides = [1, 1]} : vector<32x16xf32> to vector<32x4xf32>
    %45 = arith.truncf %44 : vector<32x4xf32> to vector<32x4xbf16>
    %46 = vector.extract_strided_slice %43 {offsets = [0, 0], sizes = [4, 32], strides = [1, 1]} : vector<16x32xf32> to vector<4x32xf32>
    %47 = arith.truncf %46 : vector<4x32xf32> to vector<4x32xbf16>
    %cst_21 = arith.constant dense<0.000000e+00> : vector<32x32xf32>
    %48 = tpu.matmul %45, %47, %cst_21 {dimension_numbers = #tpu.dot_dimension_numbers<[1], [0], [0], [1], [0, 0, 1, 1], [], []>} : vector<32x4xbf16>, vector<4x32xbf16>, vector<32x32xf32> -> vector<32x32xf32>
    %cst_22 = arith.constant dense<0xFF800000> : vector<32xf32>
    %49 = vector.multi_reduction <maximumf>, %48, %cst_22 [1] : vector<32x32xf32> to vector<32xf32>
    %50 = vector.shape_cast %49 : vector<32xf32> to vector<32x1xf32>
    %51 = vector.broadcast %50 : vector<32x1xf32> to vector<32x32xf32>
    %52 = arith.subf %48, %51 : vector<32x32xf32>
    %53 = math.exp %52 : vector<32x32xf32>
    %cst_23 = arith.constant dense<0.000000e+00> : vector<32xf32>
    %54 = vector.multi_reduction <add>, %53, %cst_23 [1] : vector<32x32xf32> to vector<32xf32>
    %55 = vector.shape_cast %54 : vector<32xf32> to vector<32x1xf32>
    %56 = tpu.reciprocal %55 {approx = true} : vector<32x1xf32> -> vector<32x1xf32>
    %57 = vector.broadcast %56 : vector<32x1xf32> to vector<32x32xf32>
    %58 = arith.mulf %53, %57 : vector<32x32xf32>
    %59 = arith.truncf %58 : vector<32x32xf32> to vector<32x32xbf16>
    %60 = vector.extract_strided_slice %42 {offsets = [0, 0], sizes = [32, 4], strides = [1, 1]} : vector<32x16xf32> to vector<32x4xf32>
    %61 = arith.truncf %60 : vector<32x4xf32> to vector<32x4xbf16>
    %cst_24 = arith.constant dense<0.000000e+00> : vector<32x4xf32>
    %62 = tpu.matmul %59, %61, %cst_24 {dimension_numbers = #tpu.dot_dimension_numbers<[1], [0], [0], [1], [0, 0, 1, 1], [], []>} : vector<32x32xbf16>, vector<32x4xbf16>, vector<32x4xf32> -> vector<32x4xf32>
    %c0_25 = arith.constant 0 : index
    %c0_26 = arith.constant 0 : index
    %63 = vector.load %arg11[%c0_25, %c0_26] : memref<32x16xf32, #tpu.memory_space<vmem>>, vector<32x4xf32>
    tpu.vector_store %arg11[%c0_25, %c0_26], %62 {strides = array<i32>} : memref<32x16xf32, #tpu.memory_space<vmem>>, vector<32x4xf32>,
    %64 = vector.extract_strided_slice %40 {offsets = [0, 4], sizes = [32, 4], strides = [1, 1]} : vector<32x16xf32> to vector<32x4xf32>
    %65 = arith.truncf %64 : vector<32x4xf32> to vector<32x4xbf16>
    %66 = vector.extract_strided_slice %43 {offsets = [4, 0], sizes = [4, 32], strides = [1, 1]} : vector<16x32xf32> to vector<4x32xf32>
    %67 = arith.truncf %66 : vector<4x32xf32> to vector<4x32xbf16>
    %cst_27 = arith.constant dense<0.000000e+00> : vector<32x32xf32>
    %68 = tpu.matmul %65, %67, %cst_27 {dimension_numbers = #tpu.dot_dimension_numbers<[1], [0], [0], [1], [0, 0, 1, 1], [], []>} : vector<32x4xbf16>, vector<4x32xbf16>, vector<32x32xf32> -> vector<32x32xf32>
    %cst_28 = arith.constant dense<0xFF800000> : vector<32xf32>
    %69 = vector.multi_reduction <maximumf>, %68, %cst_28 [1] : vector<32x32xf32> to vector<32xf32>
    %70 = vector.shape_cast %69 : vector<32xf32> to vector<32x1xf32>
    %71 = vector.broadcast %70 : vector<32x1xf32> to vector<32x32xf32>
    %72 = arith.subf %68, %71 : vector<32x32xf32>
    %73 = math.exp %72 : vector<32x32xf32>
    %cst_29 = arith.constant dense<0.000000e+00> : vector<32xf32>
    %74 = vector.multi_reduction <add>, %73, %cst_29 [1] : vector<32x32xf32> to vector<32xf32>
    %75 = vector.shape_cast %74 : vector<32xf32> to vector<32x1xf32>
    %76 = tpu.reciprocal %75 {approx = true} : vector<32x1xf32> -> vector<32x1xf32>
    %77 = vector.broadcast %76 : vector<32x1xf32> to vector<32x32xf32>
    %78 = arith.mulf %73, %77 : vector<32x32xf32>
    %79 = arith.truncf %78 : vector<32x32xf32> to vector<32x32xbf16>
    %80 = vector.extract_strided_slice %42 {offsets = [0, 4], sizes = [32, 4], strides = [1, 1]} : vector<32x16xf32> to vector<32x4xf32>
    %81 = arith.truncf %80 : vector<32x4xf32> to vector<32x4xbf16>
    %cst_30 = arith.constant dense<0.000000e+00> : vector<32x4xf32>
    %82 = tpu.matmul %79, %81, %cst_30 {dimension_numbers = #tpu.dot_dimension_numbers<[1], [0], [0], [1], [0, 0, 1, 1], [], []>} : vector<32x32xbf16>, vector<32x4xbf16>, vector<32x4xf32> -> vector<32x4xf32>
    %c0_31 = arith.constant 0 : index
    %c4 = arith.constant 4 : index
    %83 = vector.load %arg11[%c0_31, %c4] : memref<32x16xf32, #tpu.memory_space<vmem>>, vector<32x4xf32>
    tpu.vector_store %arg11[%c0_31, %c4], %82 {strides = array<i32>} : memref<32x16xf32, #tpu.memory_space<vmem>>, vector<32x4xf32>,
    %84 = vector.extract_strided_slice %40 {offsets = [0, 8], sizes = [32, 4], strides = [1, 1]} : vector<32x16xf32> to vector<32x4xf32>
    %85 = arith.truncf %84 : vector<32x4xf32> to vector<32x4xbf16>
    %86 = vector.extract_strided_slice %43 {offsets = [8, 0], sizes = [4, 32], strides = [1, 1]} : vector<16x32xf32> to vector<4x32xf32>
    %87 = arith.truncf %86 : vector<4x32xf32> to vector<4x32xbf16>
    %cst_32 = arith.constant dense<0.000000e+00> : vector<32x32xf32>
    %88 = tpu.matmul %85, %87, %cst_32 {dimension_numbers = #tpu.dot_dimension_numbers<[1], [0], [0], [1], [0, 0, 1, 1], [], []>} : vector<32x4xbf16>, vector<4x32xbf16>, vector<32x32xf32> -> vector<32x32xf32>
    %cst_33 = arith.constant dense<0xFF800000> : vector<32xf32>
    %89 = vector.multi_reduction <maximumf>, %88, %cst_33 [1] : vector<32x32xf32> to vector<32xf32>
    %90 = vector.shape_cast %89 : vector<32xf32> to vector<32x1xf32>
    %91 = vector.broadcast %90 : vector<32x1xf32> to vector<32x32xf32>
    %92 = arith.subf %88, %91 : vector<32x32xf32>
    %93 = math.exp %92 : vector<32x32xf32>
    %cst_34 = arith.constant dense<0.000000e+00> : vector<32xf32>
    %94 = vector.multi_reduction <add>, %93, %cst_34 [1] : vector<32x32xf32> to vector<32xf32>
    %95 = vector.shape_cast %94 : vector<32xf32> to vector<32x1xf32>
    %96 = tpu.reciprocal %95 {approx = true} : vector<32x1xf32> -> vector<32x1xf32>
    %97 = vector.broadcast %96 : vector<32x1xf32> to vector<32x32xf32>
    %98 = arith.mulf %93, %97 : vector<32x32xf32>
    %99 = arith.truncf %98 : vector<32x32xf32> to vector<32x32xbf16>
    %100 = vector.extract_strided_slice %42 {offsets = [0, 8], sizes = [32, 4], strides = [1, 1]} : vector<32x16xf32> to vector<32x4xf32>
    %101 = arith.truncf %100 : vector<32x4xf32> to vector<32x4xbf16>
    %cst_35 = arith.constant dense<0.000000e+00> : vector<32x4xf32>
    %102 = tpu.matmul %99, %101, %cst_35 {dimension_numbers = #tpu.dot_dimension_numbers<[1], [0], [0], [1], [0, 0, 1, 1], [], []>} : vector<32x32xbf16>, vector<32x4xbf16>, vector<32x4xf32> -> vector<32x4xf32>
    %c0_36 = arith.constant 0 : index
    %c8 = arith.constant 8 : index
    %103 = vector.load %arg11[%c0_36, %c8] : memref<32x16xf32, #tpu.memory_space<vmem>>, vector<32x4xf32>
    tpu.vector_store %arg11[%c0_36, %c8], %102 {strides = array<i32>} : memref<32x16xf32, #tpu.memory_space<vmem>>, vector<32x4xf32>,
    %104 = vector.extract_strided_slice %40 {offsets = [0, 12], sizes = [32, 4], strides = [1, 1]} : vector<32x16xf32> to vector<32x4xf32>
    %105 = arith.truncf %104 : vector<32x4xf32> to vector<32x4xbf16>
    %106 = vector.extract_strided_slice %43 {offsets = [12, 0], sizes = [4, 32], strides = [1, 1]} : vector<16x32xf32> to vector<4x32xf32>
    %107 = arith.truncf %106 : vector<4x32xf32> to vector<4x32xbf16>
    %cst_37 = arith.constant dense<0.000000e+00> : vector<32x32xf32>
    %108 = tpu.matmul %105, %107, %cst_37 {dimension_numbers = #tpu.dot_dimension_numbers<[1], [0], [0], [1], [0, 0, 1, 1], [], []>} : vector<32x4xbf16>, vector<4x32xbf16>, vector<32x32xf32> -> vector<32x32xf32>
    %cst_38 = arith.constant dense<0xFF800000> : vector<32xf32>
    %109 = vector.multi_reduction <maximumf>, %108, %cst_38 [1] : vector<32x32xf32> to vector<32xf32>
    %110 = vector.shape_cast %109 : vector<32xf32> to vector<32x1xf32>
    %111 = vector.broadcast %110 : vector<32x1xf32> to vector<32x32xf32>
    %112 = arith.subf %108, %111 : vector<32x32xf32>
    %113 = math.exp %112 : vector<32x32xf32>
    %cst_39 = arith.constant dense<0.000000e+00> : vector<32xf32>
    %114 = vector.multi_reduction <add>, %113, %cst_39 [1] : vector<32x32xf32> to vector<32xf32>
    %115 = vector.shape_cast %114 : vector<32xf32> to vector<32x1xf32>
    %116 = tpu.reciprocal %115 {approx = true} : vector<32x1xf32> -> vector<32x1xf32>
    %117 = vector.broadcast %116 : vector<32x1xf32> to vector<32x32xf32>
    %118 = arith.mulf %113, %117 : vector<32x32xf32>
    %119 = arith.truncf %118 : vector<32x32xf32> to vector<32x32xbf16>
    %120 = vector.extract_strided_slice %42 {offsets = [0, 12], sizes = [32, 4], strides = [1, 1]} : vector<32x16xf32> to vector<32x4xf32>
    %121 = arith.truncf %120 : vector<32x4xf32> to vector<32x4xbf16>
    %cst_40 = arith.constant dense<0.000000e+00> : vector<32x4xf32>
    %122 = tpu.matmul %119, %121, %cst_40 {dimension_numbers = #tpu.dot_dimension_numbers<[1], [0], [0], [1], [0, 0, 1, 1], [], []>} : vector<32x32xbf16>, vector<32x4xbf16>, vector<32x4xf32> -> vector<32x4xf32>
    %c0_41 = arith.constant 0 : index
    %c12 = arith.constant 12 : index
    %123 = vector.load %arg11[%c0_41, %c12] : memref<32x16xf32, #tpu.memory_space<vmem>>, vector<32x4xf32>
    tpu.vector_store %arg11[%c0_41, %c12], %122 {strides = array<i32>} : memref<32x16xf32, #tpu.memory_space<vmem>>, vector<32x4xf32>,
    %c0_42 = arith.constant 0 : index
    %c0_43 = arith.constant 0 : index
    %124 = vector.load %arg11[%c0_42, %c0_43] : memref<32x16xf32, #tpu.memory_space<vmem>>, vector<32x16xf32>
    %125 = arith.truncf %124 : vector<32x16xf32> to vector<32x16xbf16>
    %126 = arith.truncf %29 : vector<16x16xf32> to vector<16x16xbf16>
    %cst_44 = arith.constant dense<0.000000e+00> : vector<32x16xf32>
    %127 = tpu.matmul %125, %126, %cst_44 {dimension_numbers = #tpu.dot_dimension_numbers<[1], [0], [0], [1], [0, 0, 1, 1], [], []>} : vector<32x16xbf16>, vector<16x16xbf16>, vector<32x16xf32> -> vector<32x16xf32>
    %128 = vector.broadcast %30 : vector<1x16xf32> to vector<32x16xf32>
    %129 = arith.addf %127, %128 : vector<32x16xf32>
    %130 = arith.addf %129, %26 : vector<32x16xf32>
    %cst_45 = arith.constant dense<0.000000e+00> : vector<32xf32>
    %131 = vector.multi_reduction <add>, %130, %cst_45 [1] : vector<32x16xf32> to vector<32xf32>
    %132 = vector.shape_cast %131 : vector<32xf32> to vector<32x1xf32>
    %cst_46 = arith.constant 1.600000e+01 : f32
    %133 = vector.broadcast %cst_46 : f32 to vector<32x1xf32>
    %134 = arith.divf %132, %133 : vector<32x1xf32>
    %135 = vector.broadcast %134 : vector<32x1xf32> to vector<32x16xf32>
    %136 = arith.subf %130, %135 : vector<32x16xf32>
    %137 = vector.broadcast %134 : vector<32x1xf32> to vector<32x16xf32>
    %138 = arith.subf %130, %137 : vector<32x16xf32>
    %139 = arith.mulf %136, %138 : vector<32x16xf32>
    %cst_47 = arith.constant dense<0.000000e+00> : vector<32xf32>
    %140 = vector.multi_reduction <add>, %139, %cst_47 [1] : vector<32x16xf32> to vector<32xf32>
    %141 = vector.shape_cast %140 : vector<32xf32> to vector<32x1xf32>
    %cst_48 = arith.constant 1.600000e+01 : f32
    %142 = vector.broadcast %cst_48 : f32 to vector<32x1xf32>
    %143 = arith.divf %141, %142 : vector<32x1xf32>
    %144 = vector.broadcast %134 : vector<32x1xf32> to vector<32x16xf32>
    %145 = arith.subf %130, %144 : vector<32x16xf32>
    %cst_49 = arith.constant 9.99999996E-13 : f32
    %146 = vector.broadcast %cst_49 : f32 to vector<32x1xf32>
    %147 = arith.addf %143, %146 : vector<32x1xf32>
    %148 = math.rsqrt %147 : vector<32x1xf32>
    %149 = vector.broadcast %148 : vector<32x1xf32> to vector<32x16xf32>
    %150 = arith.mulf %145, %149 : vector<32x16xf32>
    %151 = vector.broadcast %31 : vector<1x16xf32> to vector<32x16xf32>
    %152 = arith.mulf %151, %150 : vector<32x16xf32>
    %153 = vector.broadcast %32 : vector<1x16xf32> to vector<32x16xf32>
    %154 = arith.addf %152, %153 : vector<32x16xf32>
    %cst_50 = arith.constant dense<0xFF800000> : vector<16xf32>
    %155 = vector.multi_reduction <maximumf>, %154, %cst_50 [0] : vector<32x16xf32> to vector<16xf32>
    %156 = vector.shape_cast %155 : vector<16xf32> to vector<1x16xf32>
    %157 = vector.broadcast %156 : vector<1x16xf32> to vector<32x16xf32>
    %158 = arith.subf %154, %157 : vector<32x16xf32>
    %159 = math.exp %158 : vector<32x16xf32>
    %cst_51 = arith.constant dense<0.000000e+00> : vector<16xf32>
    %160 = vector.multi_reduction <add>, %159, %cst_51 [0] : vector<32x16xf32> to vector<16xf32>
    %161 = vector.shape_cast %160 : vector<16xf32> to vector<1x16xf32>
    %162 = vector.broadcast %161 : vector<1x16xf32> to vector<32x16xf32>
    %163 = arith.divf %159, %162 : vector<32x16xf32>
    %c0_52 = arith.constant 0 : index
    %c0_53 = arith.constant 0 : index
    %c0_54 = arith.constant 0 : index
    %164 = vector.load %arg10[%c0_52, %c0_53, %c0_54] : memref<1x32x16xf32, #tpu.memory_space<vmem>>, vector<1x32x16xf32>
    %165 = vector.shape_cast %164 : vector<1x32x16xf32> to vector<32x16xf32>
    %166 = vector.shape_cast %163 : vector<32x16xf32> to vector<1x32x16xf32>
    tpu.vector_store %arg10[%c0_52, %c0_53, %c0_54], %166 {strides = array<i32>} : memref<1x32x16xf32, #tpu.memory_space<vmem>>, vector<1x32x16xf32>,
    return
  }
  func.func @transform_0(%arg0: i32) -> (i32, i32, i32) {
    %c0_i32 = arith.constant 0 : i32
    %c0_i32_0 = arith.constant 0 : i32
    %c0_i32_1 = arith.constant 0 : i32
    return %arg0, %c0_i32, %c0_i32_0 : i32, i32, i32
  }
  func.func @transform_1(%arg0: i32) -> (i32, i32) {
    %c0_i32 = arith.constant 0 : i32
    %c0_i32_0 = arith.constant 0 : i32
    %c0_i32_1 = arith.constant 0 : i32
    return %c0_i32, %c0_i32_0 : i32, i32
  }
  func.func @transform_2(%arg0: i32) -> (i32, i32) {
    %c0_i32 = arith.constant 0 : i32
    %c0_i32_0 = arith.constant 0 : i32
    %c0_i32_1 = arith.constant 0 : i32
    return %c0_i32, %c0_i32_0 : i32, i32
  }
  func.func @transform_3(%arg0: i32) -> (i32, i32) {
    %c0_i32 = arith.constant 0 : i32
    %c0_i32_0 = arith.constant 0 : i32
    %c0_i32_1 = arith.constant 0 : i32
    return %c0_i32, %c0_i32_0 : i32, i32
  }
  func.func @transform_4(%arg0: i32) -> (i32, i32) {
    %c0_i32 = arith.constant 0 : i32
    %c0_i32_0 = arith.constant 0 : i32
    %c0_i32_1 = arith.constant 0 : i32
    return %c0_i32, %c0_i32_0 : i32, i32
  }
  func.func @transform_5(%arg0: i32) -> (i32, i32) {
    %c0_i32 = arith.constant 0 : i32
    %c0_i32_0 = arith.constant 0 : i32
    %c0_i32_1 = arith.constant 0 : i32
    return %c0_i32, %c0_i32_0 : i32, i32
  }
  func.func @transform_6(%arg0: i32) -> (i32, i32) {
    %c0_i32 = arith.constant 0 : i32
    %c0_i32_0 = arith.constant 0 : i32
    %c0_i32_1 = arith.constant 0 : i32
    return %c0_i32, %c0_i32_0 : i32, i32
  }
  func.func @transform_7(%arg0: i32) -> (i32, i32) {
    %c0_i32 = arith.constant 0 : i32
    %c0_i32_0 = arith.constant 0 : i32
    %c0_i32_1 = arith.constant 0 : i32
    return %c0_i32, %c0_i32_0 : i32, i32
  }
  func.func @transform_8(%arg0: i32) -> (i32, i32) {
    %c0_i32 = arith.constant 0 : i32
    %c0_i32_0 = arith.constant 0 : i32
    %c0_i32_1 = arith.constant 0 : i32
    return %c0_i32, %c0_i32_0 : i32, i32
  }
  func.func @transform_9(%arg0: i32) -> (i32, i32, i32) {
    %c0_i32 = arith.constant 0 : i32
    %c0_i32_0 = arith.constant 0 : i32
    %c0_i32_1 = arith.constant 0 : i32
    return %arg0, %c0_i32, %c0_i32_0 : i32, i32, i32
  }
}

</mosaic_0001>

<bundles_post_ra>
// kernel: tpu_custom_call.1
= control target key start
LH: loop header
LB: loop body
LE: loop exit
PB: predicated region body
PF: predicated region fallthrough
CT: control target
= control target key end

     0   :  { %s1910_s30 = smov 0   ;;  %s2227_s0 = inlined_call_operand.vmem [shape: f32[2,3,16], index: 0, kind: input, shape index: {}]   ;;  %s2228_s1 = inlined_call_operand.vmem [shape: f32[32,3], index: 1, kind: input, shape index: {}]   ;;  %s2229_s2 = inlined_call_operand.vmem [shape: f32[32,1], index: 2, kind: input, shape index: {}]   ;;  %s2230_s3 = inlined_call_operand.vmem [shape: f32[16,48], index: 3, kind: input, shape index: {}]   ;;  %s2231_s4 = inlined_call_operand.vmem [shape: f32[1,48], index: 4, kind: input, shape index: {}]   ;;  %s2232_s5 = inlined_call_operand.vmem [shape: f32[16,16], index: 5, kind: input, shape index: {}]   ;;  %s2233_s6 = inlined_call_operand.vmem [shape: f32[1,16], index: 6, kind: input, shape index: {}]   ;;  %s2234_s7 = inlined_call_operand.vmem [shape: f32[1,16], index: 7, kind: input, shape index: {}]   ;;  %s2235_s8 = inlined_call_operand.vmem [shape: f32[1,16], index: 8, kind: input, shape index: {}]   ;;  %s2236_s9 = inlined_call_operand.vmem [shape: f32[2,32,16], index: 9, kind: output, shape index: {}]  }
   0x1 LB: > { %s1584_s10 = sadd.s32 4294967295, %s1844_s30   ;;  %p1588_p0 = scmp.ge.s32.totalorder %s1844_s30, 1  ;;  %s1844_s30 = sphi %s1910_s30, %s19_s30  }
   0x2   : > { %p286_p1 = scmp.lt.s32.totalorder %s1844_s30, 3 }
   0x4   : > { %p287_p2 = pnand %p1588_p0, %p286_p1 }
   0x5   : > { %v334_v0 = vld [vmem:[%s2228_s1 + $0x10] sm:$0xff] (!%p287_p2)  ;;  %v332_v1 = vld [vmem:[%s2228_s1] sm:$0xff] (!%p287_p2)  ;;  %v1846_v2 = vmov (!%p287_p2), 1   ;;  %v333_v3 = vld [vmem:[%s2228_s1 + $0x8] sm:$0xff] (!%p287_p2)  ;;  %v1847_v4 = vmov (!%p287_p2), 2   ;;  %v1848_v6 = vmov (!%p287_p2), 0   ;;  %v356_v18 = vlaneseq (!%p287_p2) }
   0x6   : > { %290 = sbr.rel (%p287_p2) target bundleno = 2220 (0x8ac), region = 56  ;;  %1750 = vset.pattern.permute.xlu0 (!%p287_p2), %v1846_v2  ;;  %1748 = vset.pattern.permute.xlu1 (!%p287_p2), %v1846_v2  ;;  %v335_v5 = vld [vmem:[%s2228_s1 + $0x18] sm:$0xff] (!%p287_p2)  ;;  %v424_v7 = vld [vmem:[%s2229_s2] sm:$0xff] (!%p287_p2)  ;;  %v425_v9 = vld [vmem:[%s2229_s2 + $0x8] sm:$0xff] (!%p287_p2)  ;;  %p321_p3 = scmp.lt.s32.totalorder (!%p287_p2), %s1584_s10, 1  ;;  %vm473_vm0 = vcmask (!%p287_p2), 130048  }
   0x7   : > { %377 = vperm.xlu0 (!%p287_p2), %1750, %v334_v0   ;;  %369 = vperm.xlu1 (!%p287_p2), %1748, %v332_v1   ;;  %v427_v8 = vld [vmem:[%s2229_s2 + $0x18] sm:$0xff] (!%p287_p2)  ;;  %v426_v10 = vld [vmem:[%s2229_s2 + $0x10] sm:$0xff] (!%p287_p2)  ;;  %v456_v11 = vld [vmem:[%s2230_s3] sm:$0xff] (!%p287_p2)  ;;  %v357_v21 = vshrl.u32 (!%p287_p2), %v356_v18, 7  ;;  %s1849_s18 = smov (!%p287_p2), 112   ;;  %vm584_vm1 = vcmask (!%p287_p2), 31744  }
   0x8   : > { %v457_v12 = vld [vmem:[%s2230_s3 + $0x8] sm:$0xff] (!%p287_p2)  ;;  %s1850_s19 = smov (!%p287_p2), 124   ;;  %s1851_s20 = smov (!%p287_p2), 120   ;;  %vm591_vm2 = vcmask (!%p287_p2), 1041408   ;;  %vm644_vm3 = vcmask (!%p287_p2), 261120   ;;  %vm949_vm4 = vcmask (!%p287_p2), 64544  }
   0x9   : > { %v466_v13 = vpack.c.bf16 (!%p287_p2), %v457_v12, %v456_v11  ;;  %v358_v22 = vsub.s32 (!%p287_p2), 0, %v357_v21  ;;  %v386_v24 = vsub.s32 (!%p287_p2), 1, %v357_v21  ;;  %v414_v27 = vsub.s32 (!%p287_p2), 2, %v357_v21  ;;  %s1852_s21 = smov (!%p287_p2), 116   ;;  %s1853_s22 = smov (!%p287_p2), 96  }
   0xa   : > { %s1854_s23 = smov (!%p287_p2), 92   ;;  %s1855_s24 = smov (!%p287_p2), 88   ;;  %vm1140_vm5 = vcmask (!%p287_p2), 97344   ;;  %vm1332_vm6 = vcmask (!%p287_p2), 130144  }
   0xb   : > { %1753 = vset.pattern.permute.xlu0 (!%p287_p2), %v1847_v4  ;;  %373 = vperm.xlu1 (!%p287_p2), %1748, %v333_v3   ;;  %s1856_s25 = smov (!%p287_p2), 84   ;;  %s1857_s26 = smov (!%p287_p2), 4  }
   0xc   : > { %401 = vperm.xlu0 (!%p287_p2), %1753, %v333_v3   ;;  %1653 = vmatprep.subr.bf16.mxu0 (!%p287_p2), %v466_v13  ;;  %s1858_s27 = smov (!%p287_p2), 8   ;;  %s1859_s13 = smov (!%p287_p2), 12  }
   0xd   : > { %1654 = vmatpush3.bf16.msra.mxu0 %v466_v13  ;;  %s2238_s10 = smov (!%p321_p3, %s1584_s10), 1 }
   0xe   : > { %s1589_s12 = sshll.u32 %s2238_s10, 2 }
   0xf   : > { %1749 = vset.pattern.permute.xlu1 %v1848_v6  ;;  %s324_s15 = scalar_lea.vmem %s2227_s0, %s1589_s12 }
  0x10   : > { %1754 = vset.pattern.permute.xlu0 %v1848_v6  ;;  %353 = vperm.xlu1 %1749, %v335_v5   ;;  %v331_v25 = vld [vmem:[%s324_s15] sm:$0x7] }
  0x11   : > { %338 = vperm.xlu0 %1754, %v332_v1   ;;  %v359_v28 = vrot.slane %v331_v25, %v358_v22  ;;  %v387_v29 = vrot.slane %v331_v25, %v386_v24  ;;  %v415_v31 = vrot.slane %v331_v25, %v414_v27 }
  0x14   : > { %1751 = vset.pattern.permute.xlu1 %v1846_v2 }
  0x15   : > { %343 = vperm.xlu0 %1754, %v333_v3   ;;  %381 = vperm.xlu1 %1751, %v335_v5  }
  0x19   : > { %348 = vperm.xlu0 %1754, %v334_v0   ;;  %1752 = vset.pattern.permute.xlu1 %v1847_v4 }
  0x1a   : > { %397 = vperm.xlu1 %1752, %v332_v1  }
  0x1d   : > { %430 = vperm.xlu0 %1754, %v424_v7  }
  0x1e   : > { %405 = vperm.xlu1 %1752, %v334_v0  }
  0x21   : > { %445 = vperm.xlu0 %1754, %v427_v8  }
  0x22   : > { %409 = vperm.xlu1 %1752, %v335_v5   ;;  %v1592_v5 = vld [vmem:[%s2231_s4] ss:$0 sm:$0xff] }
  0x26   : > { %1755 = vset.pattern.permute.xlu1 %v1848_v6 }
  0x27   : > { %435 = vperm.xlu1 %1755, %v425_v9  }
  0x2b   : > { %440 = vperm.xlu1 %1755, %v426_v10  }
  0x86   : > { %v370_v14 = vpop.permute.xlu1 %369  ;;  %v378_v15 = vpop.permute.xlu0 %377 }
  0x87   : > { %v388_v34 = vmul.f32 %v387_v29, %v370_v14  ;;  %v390_v50 = vmul.f32 %v387_v29, %v378_v15 }
  0x8a   : > { %v374_v16 = vpop.permute.xlu1 %373 }
  0x8b   : > { %v402_v17 = vpop.permute.xlu0 %401  ;;  %v389_v38 = vmul.f32 %v387_v29, %v374_v16 }
  0x8c   : > { %v417_v41 = vmul.f32 %v415_v31, %v402_v17 }
  0x8f   : > { %v354_v19 = vpop.permute.xlu1 %353 }
  0x90   : > { %v339_v20 = vpop.permute.xlu0 %338  ;;  %v363_v42 = vmul.f32 %v359_v28, %v354_v19 }
  0x91   : > { %v360_v32 = vmul.f32 %v359_v28, %v339_v20 }
  0x93   : > { %v392_v39 = vadd.f32 %v388_v34, %v360_v32 }
  0x94   : > { %v382_v23 = vpop.permute.xlu1 %381  ;;  %v344_v26 = vpop.permute.xlu0 %343 }
  0x95   : > { %v361_v35 = vmul.f32 %v359_v28, %v344_v26  ;;  %v391_v40 = vmul.f32 %v387_v29, %v382_v23 }
  0x97   : > { %v393_v43 = vadd.f32 %v389_v38, %v361_v35  ;;  %v395_v48 = vadd.f32 %v391_v40, %v363_v42 }
  0x98   : > { %v349_v33 = vpop.permute.xlu0 %348 }
  0x99   : > { %v398_v30 = vpop.permute.xlu1 %397  ;;  %v362_v49 = vmul.f32 %v359_v28, %v349_v33  ;;  %v421_v54 = vadd.f32 %v417_v41, %v393_v43 }
  0x9a   : > { %v416_v36 = vmul.f32 %v415_v31, %v398_v30 }
  0x9b   : > { %v394_v56 = vadd.f32 %v390_v50, %v362_v49 }
  0x9c   : > { %v420_v44 = vadd.f32 %v416_v36, %v392_v39  ;;  %v431_v46 = vpop.permute.xlu0 %430 }
  0x9d   : > { %v406_v37 = vpop.permute.xlu1 %405 }
  0x9e   : > { %v1958_v51 = vadd.f32 %v431_v46, %v420_v44  ;;  %v418_v52 = vmul.f32 %v415_v31, %v406_v37 }
  0xa0   : > { %v446_v58 = vpop.permute.xlu0 %445  ;;  %v452_v59 = vmax.f32 %v1958_v51, 0.0  ;;  %v422_v62 = vadd.f32 %v418_v52, %v394_v56 }
  0xa1   : > { %v410_v45 = vpop.permute.xlu1 %409 }
  0xa2   : > { %v419_v47 = vmul.f32 %v415_v31, %v410_v45 }
  0xa4   : > { %v423_v53 = vadd.f32 %v419_v47, %v395_v48 }
  0xa6   : > { %v436_v55 = vpop.permute.xlu1 %435  ;;  %v1963_v60 = vadd.f32 %v446_v58, %v423_v53 }
  0xa7   : > { %v1960_v57 = vadd.f32 %v436_v55, %v421_v54 }
  0xa8   : > { %v455_v3 = vmax.f32 %v1963_v60, 0.0 }
  0xa9   : > { %v453_v61 = vmax.f32 %v1960_v57, 0.0 }
  0xaa   : > { %v441_v63 = vpop.permute.xlu1 %440 }
  0xab   : > { %v1966_v0 = vadd.f32 %v441_v63, %v422_v62  ;;  %v464_v1 = vpack.c.bf16 %v453_v61, %v452_v59 }
  0xad   : > { %v454_v2 = vmax.f32 %v1966_v0, 0.0  ;;  %1655 = vmatprep.mubr.msk.bf16.mxu0 %vm473_vm0, %v464_v1 }
  0xaf   : > { %v465_v4 = vpack.c.bf16 %v455_v3, %v454_v2 }
  0xb1   : > { %1656 = vmatmul.mubr.msk.bf16.vlgmr.msra.gmra.mrb[0].mxu0 %vm473_vm0, %v465_v4 }
 0x184   : > { %v1657_v6 = vpop.f32.mrb[0].mxu0 }
 0x185   : > { %v523_v7 = vadd.f32 %v1657_v6, %v1592_v5  ;;  %v514_v8 = vpop.f32.mrb[1].mxu0 }
 0x186   : > { %v515_v9 = vadd.f32 %v1592_v5, %v514_v8  ;;  %v1658_v10 = vpop.f32.mrb[2].mxu0 }
 0x187   : > { %v526_v11 = vadd.f32 %v1658_v10, %v1592_v5  ;;  %v517_v12 = vpop.f32.mrb[3].mxu0  ;;  %v531_v14 = vmul.f32 0.5, %v523_v7 }
 0x188   : > { %v518_v13 = vadd.f32 %v1592_v5, %v517_v12  ;;  %537 = vrot.lane.b32.xlu1 %v515_v9, %s1849_s18  ;;  %v529_v17 = vmul.f32 0.5, %v515_v9 }
 0x189   : > { %v532_v15 = vmul.f32 0.5, %v526_v11  ;;  %v1983_v16 = vpack.c.bf16 %v526_v11, %v523_v7 }
 0x18a   : > { %v530_v18 = vmul.f32 0.5, %v518_v13  ;;  %v1985_v19 = vpack.c.bf16 %v518_v13, %v515_v9  ;;  %539 = vrot.lane.b32.xlu0 %v518_v13, %s1849_s18 }
 0x18b   : > { %v582_v20 = vpack.c.bf16 %v532_v15, %v531_v14 }
 0x18c   : > { %v581_v21 = vpack.c.bf16 %v530_v18, %v529_v17  ;;  %541 = vrot.lane.b32.xlu1 %v523_v7, %s1849_s18 }
 0x18e   : > { %543 = vrot.lane.b32.xlu0 %v526_v11, %s1849_s18  ;;  %1661 = vmatprep.mubr.msk.bf16.mxu1 %vm584_vm1, %v581_v21 }
 0x190   : > { %762 = vrot.lane.b32.xlu1 %v581_v21, %s1850_s19 }
 0x192   : > { %764 = vrot.lane.b32.xlu0 %v582_v20, %s1850_s19 }
 0x194   : > { %955 = vrot.lane.b32.xlu1 %v581_v21, %s1851_s20 }
 0x196   : > { %957 = vrot.lane.b32.xlu0 %v582_v20, %s1851_s20  ;;  %s1618_s20 = sshll.u32 %s2238_s10, 5 }
 0x19a   : > { %1145 = vrot.lane.b32.xlu0 %v581_v21, %s1852_s21 }
 0x19e   : > { %1147 = vrot.lane.b32.xlu0 %v582_v20, %s1852_s21 }
 0x1a2   : > { %695 = vrot.lane.b32.xlu0 %v1985_v19, %s1853_s22 }
 0x1fa   : > { %v538_v22 = vpop.permute.xlu1 %537 }
 0x1fb   : > { %549 = vxpose.xlu1.b32.start [1/4] (short) (narrow) %v538_v22, 16 }
 0x1fc   : > { %v540_v23 = vpop.permute.xlu0 %539 }
 0x1fe   : > { %v542_v25 = vpop.permute.xlu1 %541 }
 0x1ff   : > { %550 = vxpose.xlu1.b32.cont [2/4] (short) (narrow) %v540_v23, 16 }
 0x200   : > { %v544_v24 = vpop.permute.xlu0 %543 }
 0x202   : > { %v763_v31 = vpop.permute.xlu1 %762 }
 0x203   : > { %551 = vxpose.xlu1.b32.cont [3/4] (short) (narrow) %v542_v25, 16 }
 0x204   : > { %v765_v26 = vpop.permute.xlu0 %764 }
 0x206   : > { %v956_v32 = vpop.permute.xlu1 %955 }
 0x207   : > { %552 = vxpose.xlu1.b32.end [4/4] (short) (narrow) %v544_v24, 16 }
 0x208   : > { %v958_v27 = vpop.permute.xlu0 %957 }
 0x20c   : > { %v1146_v28 = vpop.permute.xlu0 %1145 }
 0x210   : > { %v1148_v29 = vpop.permute.xlu0 %1147 }
 0x214   : > { %v696_v30 = vpop.permute.xlu0 %695 }
 0x215   : > { %1665 = vmatprep.subr.bf16.mxu0 %v696_v30 }
 0x216   : > { %1666 = vmatpush3.bf16.msra.mxu0 %v696_v30 }
 0x27b   : > { %v565_v33 = vpop.trf.xlu1 }
 0x27c   : > { %v583_v34 = vpack.c.bf16 %v565_v33, %v565_v33 }
 0x27e   : > { %v767_v35 = vrot.slane %v583_v34, 2  ;;  %1721 = vmatprep.subr.msk.bf16.mxu1 %vm591_vm2, %v583_v34  ;;  %v593_v36 = vsel %vm591_vm2, %v583_v34, 0 }
 0x27f   : > { %1660 = vmatpush3.bf16.msra.mxu1 %v593_v36  ;;  %v566_v37 = vpop.trf.xlu1 }
 0x280   : > { %1722 = vmatprep.subr.msk.bf16.mxu1 %vm591_vm2, %v767_v35  ;;  %v954_v38 = vpack.c.bf16 %v566_v37, %v566_v37  ;;  %v775_v39 = vsel %vm591_vm2, %v767_v35, 0 }
 0x282   : > { %1662 = vmatmul.mubr.msk.bf16.vlgmr.msra.gmra.mrb[0].mxu1 %vm584_vm1, %v582_v20  ;;  %v1150_v40 = vrot.slane %v954_v38, 2  ;;  %v966_v41 = vsel %vm591_vm2, %v954_v38, 0 }
 0x283   : > { %1674 = vmatpush3.bf16.msra.mxu1 %v775_v39  ;;  %1675 = vmatprep.mubr.msk.bf16.mxu1 %vm584_vm1, %v763_v31 }
 0x284   : > { %1723 = vmatprep.subr.msk.bf16.mxu1 %vm591_vm2, %v954_v38  ;;  %v1158_v42 = vsel %vm591_vm2, %v1150_v40, 0 }
 0x28a   : > { %1676 = vmatmul.mubr.msk.bf16.vlgmr.msra.gmra.mrb[4].mxu1 %vm584_vm1, %v765_v26 }
 0x28b   : > { %1689 = vmatprep.mubr.msk.bf16.mxu1 %vm584_vm1, %v956_v32  ;;  %1688 = vmatpush3.bf16.msra.mxu1 %v966_v41 }
 0x28c   : > { %1724 = vmatprep.subr.msk.bf16.mxu1 %vm591_vm2, %v1150_v40 }
 0x292   : > { %1690 = vmatmul.mubr.msk.bf16.vlgmr.msra.gmra.mrb[8].mxu1 %vm584_vm1, %v958_v27 }
 0x293   : > { %1703 = vmatprep.mubr.msk.bf16.mxu1 %vm584_vm1, %v1146_v28  ;;  %1702 = vmatpush3.bf16.msra.mxu1 %v1158_v42 }
 0x29a   : > { %1704 = vmatmul.mubr.msk.bf16.vlgmr.msra.gmra.mrb[12].mxu1 %vm584_vm1, %v1148_v29 }
 0x355   : > { %v1663_v43 = vpop.f32.mrb[0].mxu1 }
 0x356   : > { %v629_v44 = vpop.f32.mrb[1].mxu1  ;;  %v651_v45 = vsel %vm644_vm3, %v1663_v43, -inf }
 0x357   : > { %652 = vmax.xlane.f32.xlu0 %v651_v45  ;;  %v1664_v46 = vpop.f32.mrb[2].mxu1  ;;  %v645_v48 = vsel %vm644_vm3, %v629_v44, -inf }
 0x358   : > { %v2006_v47 = vpop.f32.mrb[3].mxu1  ;;  %v654_v52 = vsel %vm644_vm3, %v1664_v46, -inf }
 0x359   : > { %v648_v56 = vsel %vm644_vm3, %v2006_v47, -inf }
 0x35b   : > { %646 = vmax.xlane.f32.xlu0 %v645_v48 }
 0x35d   : > { %v2009_v49 = vpop.f32.mrb[4].mxu1 }
 0x35e   : > { %v2011_v50 = vpop.f32.mrb[5].mxu1  ;;  %v832_v63 = vsel %vm644_vm3, %v2009_v49, -inf }
 0x35f   : > { %655 = vmax.xlane.f32.xlu0 %v654_v52  ;;  %v2014_v53 = vpop.f32.mrb[6].mxu1  ;;  %v826_v54 = vsel %vm644_vm3, %v2011_v50, -inf }
 0x360   : > { %827 = vmax.xlane.f32.xlu1 %v826_v54  ;;  %v2018_v55 = vpop.f32.mrb[7].mxu1  ;;  %v835_v5 = vsel %vm644_vm3, %v2014_v53, -inf }
 0x361   : > { %v829_v8 = vsel %vm644_vm3, %v2018_v55, -inf }
 0x363   : > { %649 = vmax.xlane.f32.xlu0 %v648_v56 }
 0x365   : > { %v2022_v58 = vpop.f32.mrb[8].mxu1 }
 0x366   : > { %v2024_v62 = vpop.f32.mrb[9].mxu1  ;;  %v1023_v12 = vsel %vm644_vm3, %v2022_v58, -inf }
 0x367   : > { %v2028_v1 = vpop.f32.mrb[10].mxu1  ;;  %833 = vmax.xlane.f32.xlu0 %v832_v63  ;;  %v1017_v13 = vsel %vm644_vm3, %v2024_v62, -inf }
 0x368   : > { %v2030_v4 = vpop.f32.mrb[11].mxu1  ;;  %v1026_v14 = vsel %vm644_vm3, %v2028_v1, -inf }
 0x369   : > { %v1020_v15 = vsel %vm644_vm3, %v2030_v4, -inf }
 0x36b   : > { %836 = vmax.xlane.f32.xlu0 %v835_v5 }
 0x36d   : > { %v2034_v6 = vpop.f32.mrb[12].mxu1 }
 0x36e   : > { %v2036_v7 = vpop.f32.mrb[13].mxu1  ;;  %v1215_v17 = vsel %vm644_vm3, %v2034_v6, -inf }
 0x36f   : > { %v2040_v9 = vpop.f32.mrb[14].mxu1  ;;  %830 = vmax.xlane.f32.xlu0 %v829_v8  ;;  %v1209_v18 = vsel %vm644_vm3, %v2036_v7, -inf }
 0x370   : > { %v2042_v10 = vpop.f32.mrb[15].mxu1  ;;  %v1218_v11 = vsel %vm644_vm3, %v2040_v9, -inf }
 0x371   : > { %1219 = vmax.xlane.f32.xlu1 %v1218_v11  ;;  %v1212_v20 = vsel %vm644_vm3, %v2042_v10, -inf }
 0x373   : > { %1024 = vmax.xlane.f32.xlu0 %v1023_v12 }
 0x377   : > { %1018 = vmax.xlane.f32.xlu0 %v1017_v13 }
 0x37b   : > { %1027 = vmax.xlane.f32.xlu0 %v1026_v14 }
 0x37f   : > { %1021 = vmax.xlane.f32.xlu0 %v1020_v15 }
 0x382   : > { %697 = vrot.lane.b32.xlu1 %v1983_v16, %s1853_s22 }
 0x383   : > { %1216 = vmax.xlane.f32.xlu0 %v1215_v17 }
 0x387   : > { %1210 = vmax.xlane.f32.xlu0 %v1209_v18 }
 0x39d   : > { %872 = vrot.lane.b32.xlu0 %v1985_v19, %s1854_s23 }
 0x3bc   : > { %1213 = vmax.xlane.f32.xlu0 %v1212_v20 }
 0x3d2   : > { %874 = vrot.lane.b32.xlu0 %v1983_v16, %s1854_s23  ;;  %s329_s23 = scalar_lea.vmem %s2236_s9, %s1618_s20 }
 0x3d6   : > { %1063 = vrot.lane.b32.xlu0 %v1985_v19, %s1855_s24 }
 0x3e4   : > { %v653_v21 = vpop.xlane.xlu0 %652 }
 0x3e5   : > { %v659_v22 = vsub.f32 %v1663_v43, %v653_v21 }
 0x3e7   : > { %v665_v23 = vmul.f32 1.442695, %v659_v22 }
 0x3e8   : > { %v647_v24 = vpop.xlane.xlu0 %646 }
 0x3e9   : > { %1756 = vpow2.f32 %v665_v23  ;;  %v657_v25 = vsub.f32 %v629_v44, %v647_v24 }
 0x3eb   : > { %v661_v26 = vmul.f32 1.442695, %v657_v25 }
 0x3ec   : > { %v656_v27 = vpop.xlane.xlu0 %655 }
 0x3ed   : > { %1758 = vpow2.f32 %v661_v26  ;;  %v660_v28 = vsub.f32 %v1664_v46, %v656_v27  ;;  %v828_v30 = vpop.xlane.xlu1 %827 }
 0x3ee   : > { %v838_v34 = vsub.f32 %v2011_v50, %v828_v30 }
 0x3ef   : > { %v667_v29 = vmul.f32 1.442695, %v660_v28 }
 0x3f0   : > { %v650_v31 = vpop.xlane.xlu0 %649  ;;  %v842_v40 = vmul.f32 1.442695, %v838_v34 }
 0x3f1   : > { %1760 = vpow2.f32 %v667_v29  ;;  %v658_v32 = vsub.f32 %v2006_v47, %v650_v31 }
 0x3f3   : > { %v2067_v33 = vpop.eup %1756  ;;  %v663_v35 = vmul.f32 1.442695, %v658_v32 }
 0x3f4   : > { %v834_v36 = vpop.xlane.xlu0 %833  ;;  %v675_v37 = vsel %vm644_vm3, %v2067_v33, 0.0 }
 0x3f5   : > { %1762 = vpow2.f32 %v663_v35  ;;  %v840_v38 = vsub.f32 %v2009_v49, %v834_v36  ;;  %676 = vadd.xlane.f32.xlu0 %v675_v37 }
 0x3f7   : > { %v2073_v39 = vpop.eup %1758  ;;  %v846_v41 = vmul.f32 1.442695, %v840_v38 }
 0x3f8   : > { %v837_v42 = vpop.xlane.xlu0 %836  ;;  %v669_v43 = vsel %vm644_vm3, %v2073_v39, 0.0 }
 0x3f9   : > { %1764 = vpow2.f32 %v846_v41  ;;  %v841_v44 = vsub.f32 %v2014_v53, %v837_v42  ;;  %670 = vadd.xlane.f32.xlu0 %v669_v43 }
 0x3fa   : > { %1766 = vpow2.f32 %v842_v40 }
 0x3fb   : > { %v2078_v45 = vpop.eup %1760  ;;  %v848_v46 = vmul.f32 1.442695, %v841_v44 }
 0x3fc   : > { %v831_v47 = vpop.xlane.xlu0 %830  ;;  %v678_v48 = vsel %vm644_vm3, %v2078_v45, 0.0 }
 0x3fd   : > { %1768 = vpow2.f32 %v848_v46  ;;  %v839_v49 = vsub.f32 %v2018_v55, %v831_v47  ;;  %679 = vadd.xlane.f32.xlu1 %v678_v48 }
 0x3fe   : > { %v1220_v50 = vpop.xlane.xlu1 %1219 }
 0x3ff   : > { %v2083_v52 = vpop.eup %1762  ;;  %v844_v54 = vmul.f32 1.442695, %v839_v49  ;;  %v1224_v31 = vsub.f32 %v2040_v9, %v1220_v50 }
 0x400   : > { %v1025_v56 = vpop.xlane.xlu0 %1024  ;;  %v672_v53 = vsel %vm644_vm3, %v2083_v52, 0.0 }
 0x401   : > { %1770 = vpow2.f32 %v844_v54  ;;  %v1031_v63 = vsub.f32 %v2022_v58, %v1025_v56  ;;  %673 = vadd.xlane.f32.xlu1 %v672_v53  ;;  %v1231_v37 = vmul.f32 1.442695, %v1224_v31 }
 0x402   : > { %v698_v5 = vpop.permute.xlu1 %697 }
 0x403   : > { %v2088_v8 = vpop.eup %1764  ;;  %v1037_v11 = vmul.f32 1.442695, %v1031_v63  ;;  %1667 = vmatprep.subr.bf16.mxu0 %v698_v5 }
 0x404   : > { %1668 = vmatpush3.bf16.msra.mxu0 %v698_v5  ;;  %v1019_v55 = vpop.xlane.xlu0 %1018  ;;  %v856_v12 = vsel %vm644_vm3, %v2088_v8, 0.0  ;;  %v2092_v13 = vpop.eup %1766 }
 0x405   : > { %1772 = vpow2.f32 %v1037_v11  ;;  %v1029_v14 = vsub.f32 %v2024_v62, %v1019_v55  ;;  %857 = vadd.xlane.f32.xlu0 %v856_v12  ;;  %v850_v18 = vsel %vm644_vm3, %v2092_v13, 0.0 }
 0x407   : > { %v2095_v15 = vpop.eup %1768  ;;  %v1033_v58 = vmul.f32 1.442695, %v1029_v14 }
 0x408   : > { %v1028_v17 = vpop.xlane.xlu0 %1027  ;;  %v859_v20 = vsel %vm644_vm3, %v2095_v15, 0.0 }
 0x409   : > { %1774 = vpow2.f32 %v1033_v58  ;;  %v1032_v21 = vsub.f32 %v2028_v1, %v1028_v17  ;;  %851 = vadd.xlane.f32.xlu0 %v850_v18  ;;  %860 = vadd.xlane.f32.xlu1 %v859_v20 }
 0x40b   : > { %v2102_v22 = vpop.eup %1770  ;;  %v1039_v23 = vmul.f32 1.442695, %v1032_v21 }
 0x40c   : > { %v1022_v62 = vpop.xlane.xlu0 %1021  ;;  %v853_v24 = vsel %vm644_vm3, %v2102_v22, 0.0 }
 0x40d   : > { %1776 = vpow2.f32 %v1039_v23  ;;  %v1030_v25 = vsub.f32 %v2030_v4, %v1022_v62  ;;  %854 = vadd.xlane.f32.xlu1 %v853_v24 }
 0x40f   : > { %v2107_v26 = vpop.eup %1772  ;;  %v1035_v27 = vmul.f32 1.442695, %v1030_v25 }
 0x410   : > { %v1217_v28 = vpop.xlane.xlu0 %1216  ;;  %v1047_v1 = vsel %vm644_vm3, %v2107_v26, 0.0 }
 0x411   : > { %1778 = vpow2.f32 %v1035_v27  ;;  %v1223_v29 = vsub.f32 %v2034_v6, %v1217_v28  ;;  %1048 = vadd.xlane.f32.xlu0 %v1047_v1 }
 0x413   : > { %v2112_v30 = vpop.eup %1774  ;;  %v1229_v32 = vmul.f32 1.442695, %v1223_v29 }
 0x414   : > { %v1211_v34 = vpop.xlane.xlu0 %1210  ;;  %v1041_v4 = vsel %vm644_vm3, %v2112_v30, 0.0 }
 0x415   : > { %1780 = vpow2.f32 %v1229_v32  ;;  %v1221_v35 = vsub.f32 %v2036_v7, %v1211_v34  ;;  %1042 = vadd.xlane.f32.xlu0 %v1041_v4 }
 0x417   : > { %v2118_v36 = vpop.eup %1776  ;;  %v1225_v38 = vmul.f32 1.442695, %v1221_v35 }
 0x418   : > { %v873_v40 = vpop.permute.xlu0 %872  ;;  %v1050_v6 = vsel %vm644_vm3, %v2118_v36, 0.0 }
 0x419   : > { %1782 = vpow2.f32 %v1225_v38  ;;  %1051 = vadd.xlane.f32.xlu1 %v1050_v6  ;;  %1679 = vmatprep.subr.bf16.mxu0 %v873_v40 }
 0x41a   : > { %1784 = vpow2.f32 %v1231_v37 }
 0x41b   : > { %v2122_v9 = vpop.eup %1778 }
 0x41c   : > { %v1044_v41 = vsel %vm644_vm3, %v2122_v9, 0.0 }
 0x41d   : > { %1045 = vadd.xlane.f32.xlu1 %v1044_v41 }
 0x41f   : > { %v2126_v7 = vpop.eup %1780 }
 0x420   : > { %v1239_v42 = vsel %vm644_vm3, %v2126_v7, 0.0 }
 0x421   : > { %1240 = vadd.xlane.f32.xlu1 %v1239_v42 }
 0x423   : > { %v2130_v43 = vpop.eup %1782 }
 0x424   : > { %v1233_v44 = vsel %vm644_vm3, %v2130_v43, 0.0  ;;  %v2134_v46 = vpop.eup %1784 }
 0x425   : > { %1234 = vadd.xlane.f32.xlu1 %v1233_v44  ;;  %v1242_v47 = vsel %vm644_vm3, %v2134_v46, 0.0 }
 0x429   : > { %1243 = vadd.xlane.f32.xlu1 %v1242_v47 }
 0x42b   : > { %1065 = vrot.lane.b32.xlu0 %v1983_v16, %s1855_s24 }
 0x42f   : > { %1257 = vrot.lane.b32.xlu0 %v1983_v16, %s1856_s25 }
 0x449   : > { %v1214_v48 = vpop.xlane.xlu0 %1213 }
 0x44a   : > { %v1222_v49 = vsub.f32 %v2042_v10, %v1214_v48 }
 0x44c   : > { %v1227_v50 = vmul.f32 1.442695, %v1222_v49 }
 0x44d   : > { %v875_v53 = vpop.permute.xlu0 %874 }
 0x44e   : > { %1786 = vpow2.f32 %v1227_v50 }
 0x451   : > { %v1064_v63 = vpop.permute.xlu0 %1063 }
 0x458   : > { %v2142_v54 = vpop.eup %1786 }
 0x459   : > { %v1236_v56 = vsel %vm644_vm3, %v2142_v54, 0.0 }
 0x45a   : > { %1237 = vadd.xlane.f32.xlu1 %v1236_v56 }
 0x46b   : > { %1255 = vrot.lane.b32.xlu1 %v1985_v19, %s1856_s25 }
 0x482   : > { %v677_v5 = vpop.xlane.xlu0 %676 }
 0x486   : > { %v671_v11 = vpop.xlane.xlu0 %670 }
 0x48a   : > { %v680_v55 = vpop.xlane.xlu1 %679 }
 0x48b   : > { %1788 = vrcp.f32 %v680_v55 }
 0x48c   : > { %1790 = vrcp.f32 %v671_v11 }
 0x48d   : > { %1792 = vrcp.f32 %v677_v5 }
 0x48e   : > { %v674_v16 = vpop.xlane.xlu1 %673 }
 0x48f   : > { %1794 = vrcp.f32 %v674_v16 }
 0x492   : > { %v858_v10 = vpop.xlane.xlu0 %857 }
 0x495   : > { %v1789_v12 = vpop.eup %1788 }
 0x496   : > { %v861_v14 = vpop.xlane.xlu1 %860  ;;  %v852_v58 = vpop.xlane.xlu0 %851  ;;  %v688_v19 = vmul.f32 %v1789_v12, %v2078_v45 }
 0x497   : > { %v1791_v17 = vpop.eup %1790  ;;  %1796 = vrcp.f32 %v861_v14 }
 0x498   : > { %v1793_v18 = vpop.eup %1792  ;;  %1798 = vrcp.f32 %v852_v58  ;;  %v685_v23 = vmul.f32 %v1791_v17, %v2073_v39 }
 0x499   : > { %v1795_v20 = vpop.eup %1794  ;;  %1800 = vrcp.f32 %v858_v10  ;;  %v687_v24 = vmul.f32 %v1793_v18, %v2067_v33 }
 0x49a   : > { %v855_v21 = vpop.xlane.xlu1 %854  ;;  %v686_v62 = vmul.f32 %v1795_v20, %v2083_v52 }
 0x49b   : > { %1802 = vrcp.f32 %v855_v21  ;;  %v690_v27 = vpack.c.bf16 %v688_v19, %v687_v24  ;;  %v459_v24 = vld [vmem:[%s2232_s5] sm:$0xff] }
 0x49c   : > { %v689_v25 = vpack.c.bf16 %v686_v62, %v685_v23 }
 0x49e   : > { %1669 = vmatprep.mubr.msk.bf16.mxu0 %vm644_vm3, %v689_v25  ;;  %v1049_v28 = vpop.xlane.xlu0 %1048  ;;  %v460_v25 = vld [vmem:[%s2232_s5 + $0x8] sm:$0xff] }
 0x49f   : > { %1670 = vmatmul.mubr.msk.bf16.vlgmr.msra.gmra.mrb[4].mxu0 %vm644_vm3, %v690_v27  ;;  %v1343_v27 = vpack.c.bf16 %v460_v25, %v459_v24 }
 0x4a0   : > { %1680 = vmatpush3.bf16.msra.mxu0 %v873_v40 }
 0x4a1   : > { %1681 = vmatprep.subr.bf16.mxu0 %v875_v53  ;;  %v1797_v45 = vpop.eup %1796  ;;  %1715 = vmatprep.subr.bf16.mxu1 %v1343_v27 }
 0x4a2   : > { %v1799_v1 = vpop.eup %1798  ;;  %v869_v39 = vmul.f32 %v1797_v45, %v2095_v15  ;;  %v1043_v52 = vpop.xlane.xlu0 %1042  ;;  %1716 = vmatpush3.bf16.msra.mxu1 %v1343_v27 }
 0x4a3   : > { %v1801_v29 = vpop.eup %1800  ;;  %v866_v32 = vmul.f32 %v1799_v1, %v2092_v13 }
 0x4a4   : > { %1682 = vmatpush3.bf16.msra.mxu0 %v875_v53  ;;  %v868_v4 = vmul.f32 %v1801_v29, %v2088_v8 }
 0x4a5   : > { %v1803_v31 = vpop.eup %1802  ;;  %1693 = vmatprep.subr.bf16.mxu0 %v1064_v63 }
 0x4a6   : > { %v1052_v33 = vpop.xlane.xlu1 %1051  ;;  %v867_v34 = vmul.f32 %v1803_v31, %v2102_v22  ;;  %v871_v37 = vpack.c.bf16 %v869_v39, %v868_v4  ;;  %v1066_v15 = vpop.permute.xlu0 %1065 }
 0x4a7   : > { %1804 = vrcp.f32 %v1052_v33 }
 0x4a8   : > { %v870_v35 = vpack.c.bf16 %v867_v34, %v866_v32  ;;  %1806 = vrcp.f32 %v1043_v52 }
 0x4a9   : > { %1808 = vrcp.f32 %v1049_v28 }
 0x4aa   : > { %v1046_v38 = vpop.xlane.xlu1 %1045  ;;  %1683 = vmatprep.mubr.msk.bf16.mxu0 %vm644_vm3, %v870_v35 }
 0x4ab   : > { %1810 = vrcp.f32 %v1046_v38  ;;  %1684 = vmatmul.mubr.msk.bf16.vlgmr.msra.gmra.mrb[8].mxu0 %vm644_vm3, %v871_v37 }
 0x4ac   : > { %1694 = vmatpush3.bf16.msra.mxu0 %v1064_v63 }
 0x4ad   : > { %1695 = vmatprep.subr.bf16.mxu0 %v1066_v15 }
 0x4ae   : > { %v1241_v49 = vpop.xlane.xlu1 %1240 }
 0x4b0   : > { %1696 = vmatpush3.bf16.msra.mxu0 %v1066_v15 }
 0x4b1   : > { %v1805_v13 = vpop.eup %1804 }
 0x4b2   : > { %v1807_v40 = vpop.eup %1806  ;;  %v1060_v8 = vmul.f32 %v1805_v13, %v2118_v36  ;;  %v1235_v50 = vpop.xlane.xlu1 %1234 }
 0x4b3   : > { %v1809_v22 = vpop.eup %1808  ;;  %v1057_v41 = vmul.f32 %v1807_v40, %v2112_v30  ;;  %v1258_v30 = vpop.permute.xlu0 %1257 }
 0x4b4   : > { %v1059_v44 = vmul.f32 %v1809_v22, %v2107_v26 }
 0x4b5   : > { %v1811_v6 = vpop.eup %1810 }
 0x4b6   : > { %v1058_v42 = vmul.f32 %v1811_v6, %v2122_v9  ;;  %v1062_v48 = vpack.c.bf16 %v1060_v8, %v1059_v44  ;;  %v1244_v56 = vpop.xlane.xlu1 %1243  ;;  %v1611_v44 = vld [vmem:[%s2233_s6] ss:$0 sm:$0xff] }
 0x4b7   : > { %1812 = vrcp.f32 %v1244_v56 }
 0x4b8   : > { %v1061_v47 = vpack.c.bf16 %v1058_v42, %v1057_v41  ;;  %1814 = vrcp.f32 %v1235_v50 }
 0x4b9   : > { %1816 = vrcp.f32 %v1241_v49 }
 0x4ba   : > { %1697 = vmatprep.mubr.msk.bf16.mxu0 %vm644_vm3, %v1061_v47 }
 0x4bb   : > { %1698 = vmatmul.mubr.msk.bf16.vlgmr.msra.gmra.mrb[12].mxu0 %vm644_vm3, %v1062_v48 }
 0x4c1   : > { %v1813_v26 = vpop.eup %1812 }
 0x4c2   : > { %v1815_v9 = vpop.eup %1814  ;;  %v1252_v11 = vmul.f32 %v1813_v26, %v2134_v46 }
 0x4c3   : > { %v1817_v63 = vpop.eup %1816  ;;  %v1249_v55 = vmul.f32 %v1815_v9, %v2130_v43 }
 0x4c4   : > { %v1251_v10 = vmul.f32 %v1817_v63, %v2126_v7 }
 0x4c6   : > { %v1254_v14 = vpack.c.bf16 %v1252_v11, %v1251_v10 }
 0x4e7   : > { %v1238_v53 = vpop.xlane.xlu1 %1237 }
 0x4e8   : > { %1818 = vrcp.f32 %v1238_v53 }
 0x4eb   : > { %v1256_v36 = vpop.permute.xlu1 %1255 }
 0x4ec   : > { %1707 = vmatprep.subr.bf16.mxu0 %v1256_v36 }
 0x4ed   : > { %1708 = vmatpush3.bf16.msra.mxu0 %v1256_v36 }
 0x4ee   : > { %1709 = vmatprep.subr.bf16.mxu0 %v1258_v30 }
 0x4f1   : > { %1710 = vmatpush3.bf16.msra.mxu0 %v1258_v30 }
 0x4f2   : > { %v1819_v5 = vpop.eup %1818 }
 0x4f3   : > { %v1250_v16 = vmul.f32 %v1819_v5, %v2142_v54 }
 0x4f5   : > { %v1253_v12 = vpack.c.bf16 %v1250_v16, %v1249_v55 }
 0x4f7   : > { %1711 = vmatprep.mubr.msk.bf16.mxu0 %vm644_vm3, %v1253_v12 }
 0x4f8   : > { %1712 = vmatmul.mubr.msk.bf16.vlgmr.msra.gmra.mrb[16].mxu0 %vm644_vm3, %v1254_v14 }
 0x572   : > { %v1671_v58 = vpop.f32.mrb[4].mxu0 }
 0x573   : > { %758 = vst.msk [vmem:[#allocation2 + $0x10] sm:$0xff] %vm584_vm1, %v1671_v58  ;;  %v741_v17 = vpop.f32.mrb[5].mxu0 }
 0x574   : > { %756 = vst.msk [vmem:[#allocation2] sm:$0xff] %vm584_vm1, %v741_v17  ;;  %v1672_v18 = vpop.f32.mrb[6].mxu0 }
 0x575   : > { %759 = vst.msk [vmem:[#allocation2 + $0x18] sm:$0xff] %vm584_vm1, %v1672_v18  ;;  %v744_v43 = vpop.f32.mrb[7].mxu0 }
 0x576   : > { %757 = vst.msk [vmem:[#allocation2 + $0x8] sm:$0xff] %vm584_vm1, %v744_v43 }
 0x57e   : > { %v1685_v46 = vpop.f32.mrb[8].mxu0 }
 0x57f   : > { %941 = vrot.lane.b32.xlu1 %v1685_v46, %s1857_s26  ;;  %v918_v7 = vpop.f32.mrb[9].mxu0 }
 0x580   : > { %v1686_v54 = vpop.f32.mrb[10].mxu0 }
 0x581   : > { %943 = vrot.lane.b32.xlu0 %v1686_v54, %s1857_s26  ;;  %v921_v20 = vpop.f32.mrb[11].mxu0 }
 0x583   : > { %937 = vrot.lane.b32.xlu1 %v918_v7, %s1857_s26 }
 0x585   : > { %939 = vrot.lane.b32.xlu0 %v921_v20, %s1857_s26 }
 0x58e   : > { %v1699_v19 = vpop.f32.mrb[12].mxu0 }
 0x58f   : > { %1132 = vrot.lane.b32.xlu1 %v1699_v19, %s1858_s27  ;;  %v1109_v21 = vpop.f32.mrb[13].mxu0 }
 0x590   : > { %v1700_v23 = vpop.f32.mrb[14].mxu0 }
 0x591   : > { %1134 = vrot.lane.b32.xlu0 %v1700_v23, %s1858_s27  ;;  %v1112_v62 = vpop.f32.mrb[15].mxu0 }
 0x593   : > { %1128 = vrot.lane.b32.xlu1 %v1109_v21, %s1858_s27 }
 0x595   : > { %1130 = vrot.lane.b32.xlu0 %v1112_v62, %s1858_s27 }
 0x5cb   : > { %v1713_v28 = vpop.f32.mrb[16].mxu0 }
 0x5cc   : > { %v1301_v45 = vpop.f32.mrb[17].mxu0 }
 0x5cd   : > { %1320 = vrot.lane.b32.xlu1 %v1301_v45, %s1859_s13  ;;  %v1714_v1 = vpop.f32.mrb[18].mxu0 }
 0x5ce   : > { %v1304_v29 = vpop.f32.mrb[19].mxu0 }
 0x5cf   : > { %1322 = vrot.lane.b32.xlu0 %v1304_v29, %s1859_s13 }
 0x5d1   : > { %1324 = vrot.lane.b32.xlu1 %v1713_v28, %s1859_s13 }
 0x5d3   : > { %1326 = vrot.lane.b32.xlu0 %v1714_v1, %s1859_s13 }
 0x5f1   : > { %v942_v31 = vpop.permute.xlu1 %941 }
 0x5f2   : > { %952 = vst.msk [vmem:[#allocation2 + $0x10] sm:$0xff] %vm949_vm4, %v942_v31 }
 0x5f3   : > { %v944_v39 = vpop.permute.xlu0 %943 }
 0x5f4   : > { %953 = vst.msk [vmem:[#allocation2 + $0x18] sm:$0xff] %vm949_vm4, %v944_v39 }
 0x5f5   : > { %v938_v52 = vpop.permute.xlu1 %937 }
 0x5f6   : > { %950 = vst.msk [vmem:[#allocation2] sm:$0xff] %vm949_vm4, %v938_v52 }
 0x5f7   : > { %v940_v33 = vpop.permute.xlu0 %939 }
 0x5f8   : > { %951 = vst.msk [vmem:[#allocation2 + $0x8] sm:$0xff] %vm949_vm4, %v940_v33 }
 0x601   : > { %v1133_v32 = vpop.permute.xlu1 %1132 }
 0x602   : > { %1143 = vst.msk [vmem:[#allocation2 + $0x10] sm:$0xff] %vm1140_vm5, %v1133_v32 }
 0x603   : > { %v1135_v34 = vpop.permute.xlu0 %1134 }
 0x604   : > { %1144 = vst.msk [vmem:[#allocation2 + $0x18] sm:$0xff] %vm1140_vm5, %v1135_v34 }
 0x605   : > { %v1129_v4 = vpop.permute.xlu1 %1128 }
 0x606   : > { %1141 = vst.msk [vmem:[#allocation2] sm:$0xff] %vm1140_vm5, %v1129_v4  ;;  %v1614_v4 = vld [vmem:[%s2234_s7] ss:$0 sm:$0xff] }
 0x607   : > { %v1131_v35 = vpop.permute.xlu0 %1130 }
 0x608   : > { %1142 = vst.msk [vmem:[#allocation2 + $0x8] sm:$0xff] %vm1140_vm5, %v1131_v35 }
 0x63f   : > { %v1321_v37 = vpop.permute.xlu1 %1320 }
 0x640   : > { %1333 = vst.msk [vmem:[#allocation2] sm:$0xff] %vm1332_vm6, %v1321_v37 }
 0x641   : > { %v1323_v38 = vpop.permute.xlu0 %1322 }
 0x642   : > { %1334 = vst.msk [vmem:[#allocation2 + $0x8] sm:$0xff] %vm1332_vm6, %v1323_v38 }
 0x643   : > { %v1325_v15 = vpop.permute.xlu1 %1324 }
 0x644   : > { %1335 = vst.msk [vmem:[#allocation2 + $0x10] sm:$0xff] %vm1332_vm6, %v1325_v15 }
 0x645   : > { %v1327_v13 = vpop.permute.xlu0 %1326 }
 0x646   : > { %1336 = vst.msk [vmem:[#allocation2 + $0x18] sm:$0xff] %vm1332_vm6, %v1327_v13 }
 0x647   : > { %v1337_v40 = vld [vmem:[#allocation2] sm:$0xff] }
 0x649   : > { %v1338_v22 = vld [vmem:[#allocation2 + $0x8] sm:$0xff] }
 0x64a   : > { %v1341_v6 = vpack.c.bf16 %v1338_v22, %v1337_v40  ;;  %v1615_v40 = vld [vmem:[%s2235_s8] ss:$0 sm:$0xff] }
 0x64b   : > { %v1339_v8 = vld [vmem:[#allocation2 + $0x10] sm:$0xff] }
 0x64c   : > { %1717 = vmatprep.mubr.msk.bf16.mxu1 %vm473_vm0, %v1341_v6 }
 0x64d   : > { %v1340_v41 = vld [vmem:[#allocation2 + $0x18] sm:$0xff] }
 0x64e   : > { %v1342_v42 = vpack.c.bf16 %v1340_v41, %v1339_v8 }
 0x650   : > { %1718 = vmatmul.mubr.msk.bf16.vlgmr.msra.gmra.mrb[16].mxu1 %vm473_vm0, %v1342_v42 }
 0x723   : > { %v1719_v47 = vpop.f32.mrb[16].mxu1 }
 0x724   : > { %v1390_v48 = vpop.f32.mrb[17].mxu1  ;;  %v1399_v36 = vadd.f32 %v1719_v47, %v1611_v44 }
 0x725   : > { %v1391_v49 = vadd.f32 %v1611_v44, %v1390_v48  ;;  %v1720_v50 = vpop.f32.mrb[18].mxu1 }
 0x726   : > { %v1402_v56 = vadd.f32 %v1720_v50, %v1611_v44  ;;  %v1393_v53 = vpop.f32.mrb[19].mxu1  ;;  %v1407_v55 = vadd.f32 %v1399_v36, %v454_v2 }
 0x727   : > { %v1394_v30 = vadd.f32 %v1611_v44, %v1393_v53  ;;  %v1405_v26 = vadd.f32 %v1391_v49, %v452_v59 }
 0x728   : > { %v1408_v5 = vadd.f32 %v1402_v56, %v455_v3  ;;  %v1415_v51 = vsel %vm473_vm0, %v1407_v55, 0.0 }
 0x729   : > { %v1409_v9 = vsel %vm473_vm0, %v1405_v26, 0.0  ;;  %v1406_v63 = vadd.f32 %v1394_v30, %v453_v61 }
 0x72a   : > { %1410 = vadd.xlane.f32.xlu1 %v1409_v9  ;;  %v1418_v16 = vsel %vm473_vm0, %v1408_v5, 0.0 }
 0x72b   : > { %v1412_v11 = vsel %vm473_vm0, %v1406_v63, 0.0 }
 0x72c   : > { %1413 = vadd.xlane.f32.xlu0 %v1412_v11 }
 0x72e   : > { %1419 = vadd.xlane.f32.xlu1 %v1418_v16 }
 0x730   : > { %1416 = vadd.xlane.f32.xlu0 %v1415_v51 }
 0x7b7   : > { %v1411_v59 = vpop.xlane.xlu1 %1410 }
 0x7b8   : > { %v1422_v10 = vmul.f32 0.0625, %v1411_v59 }
 0x7b9   : > { %v1414_v57 = vpop.xlane.xlu0 %1413 }
 0x7ba   : > { %v1426_v61 = vsub.f32 %v1405_v26, %v1422_v10  ;;  %v1423_v12 = vmul.f32 0.0625, %v1414_v57 }
 0x7bb   : > { %v1420_v60 = vpop.xlane.xlu1 %1419 }
 0x7bc   : > { %v1427_v3 = vsub.f32 %v1406_v63, %v1423_v12  ;;  %v1425_v14 = vmul.f32 0.0625, %v1420_v60  ;;  %v1430_v58 = vmul.f32 %v1426_v61, %v1426_v61 }
 0x7bd   : > { %v1417_v17 = vpop.xlane.xlu0 %1416 }
 0x7be   : > { %v1429_v18 = vsub.f32 %v1408_v5, %v1425_v14  ;;  %v1424_v0 = vmul.f32 0.0625, %v1417_v17  ;;  %v1434_v2 = vsel %vm473_vm0, %v1430_v58, 0.0  ;;  %v1431_v43 = vmul.f32 %v1427_v3, %v1427_v3 }
 0x7bf   : > { %1435 = vadd.xlane.f32.xlu0 %v1434_v2 }
 0x7c0   : > { %v1428_v46 = vsub.f32 %v1407_v55, %v1424_v0  ;;  %v1437_v7 = vsel %vm473_vm0, %v1431_v43, 0.0  ;;  %v1433_v54 = vmul.f32 %v1429_v18, %v1429_v18 }
 0x7c1   : > { %1438 = vadd.xlane.f32.xlu1 %v1437_v7 }
 0x7c2   : > { %v1432_v20 = vmul.f32 %v1428_v46, %v1428_v46  ;;  %v1443_v21 = vsel %vm473_vm0, %v1433_v54, 0.0 }
 0x7c4   : > { %v1440_v19 = vsel %vm473_vm0, %v1432_v20, 0.0 }
 0x7c5   : > { %1441 = vadd.xlane.f32.xlu0 %v1440_v19  ;;  %1444 = vadd.xlane.f32.xlu1 %v1443_v21 }
 0x84c   : > { %v1436_v23 = vpop.xlane.xlu0 %1435 }
 0x84d   : > { %v1446_v62 = vmul.f32 0.0625, %v1436_v23 }
 0x84e   : > { %v1439_v24 = vpop.xlane.xlu1 %1438 }
 0x84f   : > { %v1450_v25 = vadd.f32 1e-12, %v1446_v62  ;;  %v1447_v27 = vmul.f32 0.0625, %v1439_v24 }
 0x851   : > { %1820 = vrsqrt.f32 %v1450_v25  ;;  %v1451_v28 = vadd.f32 1e-12, %v1447_v27 }
 0x852   : > { %v1442_v45 = vpop.xlane.xlu0 %1441  ;;  %v1445_v1 = vpop.xlane.xlu1 %1444 }
 0x853   : > { %1822 = vrsqrt.f32 %v1451_v28  ;;  %v1448_v29 = vmul.f32 0.0625, %v1442_v45  ;;  %v1449_v31 = vmul.f32 0.0625, %v1445_v1 }
 0x855   : > { %v1452_v39 = vadd.f32 1e-12, %v1448_v29  ;;  %v1453_v52 = vadd.f32 1e-12, %v1449_v31 }
 0x857   : > { %1824 = vrsqrt.f32 %v1452_v39 }
 0x858   : > { %1826 = vrsqrt.f32 %v1453_v52 }
 0x85b   : > { %v1821_v33 = vpop.eup %1820 }
 0x85c   : > { %v1458_v34 = vmul.f32 %v1821_v33, %v1426_v61 }
 0x85d   : > { %v1823_v32 = vpop.eup %1822 }
 0x85e   : > { %v1459_v35 = vmul.f32 %v1823_v32, %v1427_v3  ;;  %v1468_v15 = vmul.f32 %v1614_v4, %v1458_v34 }
 0x860   : > { %v1469_v37 = vmul.f32 %v1614_v4, %v1459_v35  ;;  %v1478_v42 = vadd.f32 %v1615_v40, %v1468_v15 }
 0x861   : > { %v1825_v38 = vpop.eup %1824 }
 0x862   : > { %v1827_v13 = vpop.eup %1826  ;;  %v1460_v22 = vmul.f32 %v1825_v38, %v1428_v46  ;;  %v1479_v6 = vadd.f32 %v1615_v40, %v1469_v37  ;;  %v1482_v56 = vsel %vm473_vm0, %v1478_v42, -inf }
 0x863   : > { %v1461_v8 = vmul.f32 %v1827_v13, %v1429_v18 }
 0x864   : > { %v1470_v41 = vmul.f32 %v1614_v4, %v1460_v22  ;;  %v1483_v48 = vsel %vm473_vm0, %v1479_v6, -inf }
 0x865   : > { %v1471_v44 = vmul.f32 %v1614_v4, %v1461_v8  ;;  %v1486_v36 = vmax.f32 %v1482_v56, %v1483_v48 }
 0x866   : > { %v1480_v47 = vadd.f32 %v1615_v40, %v1470_v41 }
 0x867   : > { %v1481_v49 = vadd.f32 %v1615_v40, %v1471_v44 }
 0x868   : > { %v1484_v50 = vsel %vm473_vm0, %v1480_v47, -inf }
 0x869   : > { %v1485_v53 = vsel %vm473_vm0, %v1481_v49, -inf }
 0x86a   : > { %v1487_v30 = vmax.f32 %v1484_v50, %v1485_v53 }
 0x86c   : > { %v1488_v26 = vmax.f32 %v1486_v36, %v1487_v30 }
 0x86e   : > { %v1489_v9 = vrot.slane %v1488_v26, 4 }
 0x870   : > { %v1490_v63 = vmax.f32 %v1488_v26, %v1489_v9 }
 0x872   : > { %v1491_v5 = vrot.slane %v1490_v63, 2 }
 0x874   : > { %v1492_v11 = vmax.f32 %v1490_v63, %v1491_v5 }
 0x876   : > { %v1493_v55 = vrot.slane %v1492_v11, 1 }
 0x878   : > { %v1494_v16 = vmax.f32 %v1492_v11, %v1493_v55 }
 0x87a   : > { %v1495_v51 = vsub.f32 %v1478_v42, %v1494_v16  ;;  %v1496_v59 = vsub.f32 %v1479_v6, %v1494_v16  ;;  %v1497_v10 = vsub.f32 %v1480_v47, %v1494_v16  ;;  %v1498_v57 = vsub.f32 %v1481_v49, %v1494_v16 }
 0x87c   : > { %v1499_v61 = vmul.f32 1.442695, %v1495_v51  ;;  %v1501_v12 = vmul.f32 1.442695, %v1496_v59  ;;  %v1503_v60 = vmul.f32 1.442695, %v1497_v10 }
 0x87d   : > { %v1505_v3 = vmul.f32 1.442695, %v1498_v57 }
 0x87e   : > { %1828 = vpow2.f32 %v1499_v61 }
 0x87f   : > { %1830 = vpow2.f32 %v1501_v12 }
 0x880   : > { %1832 = vpow2.f32 %v1503_v60 }
 0x881   : > { %1834 = vpow2.f32 %v1505_v3 }
 0x888   : > { %v1829_v14 = vpop.eup %1828 }
 0x889   : > { %v1831_v58 = vpop.eup %1830  ;;  %v1507_v17 = vsel %vm473_vm0, %v1829_v14, 0.0 }
 0x88a   : > { %v1833_v18 = vpop.eup %1832  ;;  %v1508_v0 = vsel %vm473_vm0, %v1831_v58, 0.0 }
 0x88b   : > { %v1835_v2 = vpop.eup %1834  ;;  %v1509_v43 = vadd.f32 %v1508_v0, %v1507_v17  ;;  %v1510_v46 = vsel %vm473_vm0, %v1833_v18, 0.0 }
 0x88c   : > { %v1512_v54 = vsel %vm473_vm0, %v1835_v2, 0.0 }
 0x88d   : > { %v1511_v7 = vadd.f32 %v1510_v46, %v1509_v43 }
 0x88f   : > { %v1513_v20 = vadd.f32 %v1512_v54, %v1511_v7 }
 0x891   : > { %v1514_v19 = vrot.slane %v1513_v20, 4 }
 0x893   : > { %v1515_v21 = vadd.f32 %v1514_v19, %v1513_v20 }
 0x895   : > { %v1516_v23 = vrot.slane %v1515_v21, 2 }
 0x897   : > { %v1517_v62 = vadd.f32 %v1516_v23, %v1515_v21 }
 0x899   : > { %v1518_v24 = vrot.slane %v1517_v62, 1 }
 0x89b   : > { %v1519_v25 = vadd.f32 %v1518_v24, %v1517_v62 }
 0x89d   : > { %1836 = vrcp.f32 %v1519_v25 }
 0x8a7   : > { %v1837_v27 = vpop.eup %1836 }
 0x8a8   : > { %v1521_v28 = vmul.f32 %v1837_v27, %v1829_v14  ;;  %v1522_v45 = vmul.f32 %v1837_v27, %v1831_v58  ;;  %v1523_v1 = vmul.f32 %v1837_v27, %v1833_v18  ;;  %v1524_v29 = vmul.f32 %v1837_v27, %v1835_v2 }
 0x8aa   : > { %1525 = vst.msk [vmem:[%s329_s23] sm:$0xff] %vm473_vm0, %v1521_v28  ;;  %1526 = vst.msk [vmem:[%s329_s23 + $0x8] sm:$0xff] %vm473_vm0, %v1522_v45 }
 0x8ab   : > { %1527 = vst.msk [vmem:[%s329_s23 + $0x10] sm:$0xff] %vm473_vm0, %v1523_v1  ;;  %1528 = vst.msk [vmem:[%s329_s23 + $0x18] sm:$0xff] %vm473_vm0, %v1524_v29 }
 0x8ac PF: > { %s19_s30 = sadd.s32 1, %s1844_s30  }
 0x8ad   : > { %p16_p4 = scmp.ge.s32.totalorder %s19_s30, 4  }
 0x8af   :  { %18 = sbr.rel (!%p16_p4) target bundleno = 1 (0x1), region = 86 }

</bundles_post_ra>
